<compile_context>
chip_gen: v7x
topology: tpu7x:2x2x1
jax: 0.10.0
libtpu: 0.0.40
codegen_flags: <defaults>
</compile_context>

<pallas_src>
import math
import functools

import jax
import jax.numpy as jnp
from jax.experimental import pallas as pl
from jax.experimental.pallas import tpu as pltpu


def _layer_norm(x, gamma, beta, eps=1e-5):
    mean = jnp.mean(x, axis=-1, keepdims=True)
    var = jnp.mean((x - mean) ** 2, axis=-1, keepdims=True)
    return (x - mean) * jax.lax.rsqrt(var + eps) * gamma + beta


def _temporal_att_kernel(heads, d_q, T, fast_math,
                         xq_ref, xk_ref, xv_ref,
                         wqkv_ref, wfc_ref, wff1_ref, wff2_ref,
                         vec_ref, bff1_ref, out_ref):
    D = heads * d_q
    R = xq_ref.shape[0]              # rows in this block (= objects * T)
    OB = R // T                      # objects in this block
    mm_dt = jnp.bfloat16 if fast_math else jnp.float32

    def mm(a, b):
        # MXU matmul; bf16 operands (f32 accumulation) on the fast path.
        return jnp.dot(a.astype(mm_dt), b.astype(mm_dt),
                       preferred_element_type=jnp.float32)

    xq_in = xq_ref[...]
    xq_f32 = xq_in.astype(jnp.float32)           # residual path stays f32

    vec = vec_ref[...]                           # (9, D) packed small params
    bq, bk, bv = vec[0:1], vec[1:2], vec[2:3]
    bfc, g1, be1 = vec[3:4], vec[4:5], vec[5:6]
    bff2, g2, be2 = vec[6:7], vec[7:8], vec[8:9]
    bff1 = bff1_ref[...]                         # (1, 2D)

    # QKV projections as one (R, D) x (D, D) GEMM each; the 1/sqrt(d_q) scale
    # is folded into Q once instead of into every (T, T) score tile.
    scale = 1.0 / math.sqrt(d_q)
    Q = (mm(xq_in, wqkv_ref[0]) + bq) * scale
    K = mm(xk_ref[...], wqkv_ref[1]) + bk
    V = mm(xv_ref[...], wqkv_ref[2]) + bv

    # (OB, T, D) views: sublane-tile-aligned row split (T == 8), no lane
    # relayout.  Cast to the matmul dtype once (hoisted out of the head loop).
    Q3 = Q.reshape(OB, T, D).astype(mm_dt)
    K3 = K.reshape(OB, T, D).astype(mm_dt)
    V3 = V.reshape(OB, T, D).astype(mm_dt)

    # Per-head attention, batched over every object in the block (static,
    # 4-iteration loop).
    ctx_heads = []
    for h in range(heads):
        lo = h * d_q
        Qh = Q3[:, :, lo:lo + d_q]
        Kh = K3[:, :, lo:lo + d_q]
        Vh = V3[:, :, lo:lo + d_q]
        s = jnp.einsum('btd,bsd->bts', Qh, Kh,
                       preferred_element_type=jnp.float32)
        s = s - jnp.max(s, axis=-1, keepdims=True)   # inputs unbounded: keep
        e = jnp.exp(s)
        den = jnp.sum(e, axis=-1, keepdims=True)
        if fast_math:
            # EUP reciprocal: softmax rows sum to 1 only approximately.
            p = e * pl.reciprocal(den, approx=True)
        else:
            p = e / den
        # TODO(synk): dropout1 (p=0.1) is identity under eval-mode semantics.
        ctx_heads.append(
            jnp.einsum('bts,bsd->btd', p.astype(mm_dt), Vh,
                       preferred_element_type=jnp.float32))
    # TODO(synk): the (OB,T,T) softmax tiles keep an 8-wide minor dim; making
    # them lane-dense needs a head<->time transpose / (.,128) repacking whose
    # in-kernel minor-dim reshapes are relayout hazards (left as follow-up).

    # Assemble head contexts once and run fc as a single K=D GEMM
    # (instead of `heads` K=d_q GEMMs summed).
    ctx = jnp.concatenate(ctx_heads, axis=-1).reshape(R, D)
    fc = mm(ctx, wfc_ref[...]) + bfc
    # TODO(synk): dropout2 (p=0.1) is identity under eval-mode semantics.

    # Residual + LayerNorm, FeedForward (D -> 2D -> D, ReLU), residual + LN,
    # all in f32 over the whole row block.
    h1 = _layer_norm(fc + xq_f32, g1, be1)
    ff = jnp.maximum(mm(h1, wff1_ref[...]) + bff1, 0.0)
    ff = mm(ff, wff2_ref[...]) + bff2
    out = _layer_norm(ff + h1, g2, be2)
    out_ref[...] = out.astype(out_ref.dtype)


def _pick_obj_block(BN, requested, fit_cap):
    """Objects per grid step.

    Big blocks amortize the ~0.35us per-step pipeline overhead; `fit_cap`
    keeps double-buffered blocks + temporaries inside VMEM; >= 2 (even) steps
    let the "parallel" grid axis shard across v7x's two TensorCores.
    """
    ob = max(1, min(int(requested), int(fit_cap), BN))
    n = pl.cdiv(BN, ob)
    if n == 1 and BN >= 128:
        n = 2                      # enough work: give both v7x TCs a step
    elif n > 1 and n % 2 == 1:
        n += 1                     # even step count splits cleanly across 2 TCs
    ob = pl.cdiv(BN, n)
    n = pl.cdiv(BN, ob)
    return ob, n


def temporal_att_pallas(xq, xk, xv, params, heads, *, obj_block=512,
                        fast_math=True):
    """TemporalAtt forward (eval mode).

    fast_math=True (default): bf16 matmul operands, f32 accumulation, f32
    softmax/LayerNorm, approx reciprocal.  Pass bf16 activations to also halve
    activation DMA bytes.  fast_math=False: exact f32 validation path.
    """
    B, N, T, D = xq.shape
    assert D % heads == 0
    d_q = D // heads
    BN = B * N

    # Hardware-aware sizing: query VMEM capacity (v5e/v6e 128 MiB, v7x 64 MiB)
    # and fall back to the conservative 64 MiB if the query is unavailable.
    try:
        vmem_cap = int(pltpu.get_tpu_info().vmem_capacity_bytes)
    except Exception:
        vmem_cap = 64 * 1024 * 1024
    # Per-object VMEM estimate: (3 in + 1 out) double-buffered blocks plus
    # ~6 live f32 temporaries, all lane-padded to 128.
    per_obj_bytes = T * 128 * 4 * (2 * 4 + 6)
    ob_fit = max(8, int(0.6 * vmem_cap) // per_obj_bytes)
    ob, n_steps = _pick_obj_block(BN, obj_block, ob_fit)
    R_blk = ob * T
    vmem_limit = int(min(max(int(0.85 * vmem_cap), 32 * 1024 * 1024),
                         128 * 1024 * 1024))

    w_dt = jnp.bfloat16 if fast_math else jnp.float32

    # Activations: flatten only.  No wrapper-side pad or dtype copy; ragged
    # last blocks are handled by Pallas block masking (whole garbage objects,
    # dropped on write).
    def rows(x):
        return x.reshape(BN * T, D)

    xq2, xk2, xv2 = rows(xq), rows(xk), rows(xv)

    # Packed parameters (fewer BlockSpecs / DMA descriptors / VMEM tiles).
    w_qkv = jnp.stack([params["wq"], params["wk"], params["wv"]]).astype(w_dt)
    w_fc = params["wfc"].astype(w_dt)
    w_ff1 = params["wff1"].astype(w_dt)
    w_ff2 = params["wff2"].astype(w_dt)
    vec = jnp.concatenate(
        [params["bq"], params["bk"], params["bv"], params["bfc"],
         params["g1"], params["be1"], params["bff2"], params["g2"],
         params["be2"]], axis=0).astype(jnp.float32)          # (9, D)
    b_ff1 = params["bff1"].astype(jnp.float32)                # (1, 2D)

    row_spec = pl.BlockSpec((R_blk, D), lambda i: (i, 0))

    def full_spec(p):
        nd = p.ndim
        return pl.BlockSpec(p.shape, lambda i: (0,) * nd)

    out = pl.pallas_call(
        functools.partial(_temporal_att_kernel, heads, d_q, T, fast_math),
        grid=(n_steps,),
        in_specs=[row_spec, row_spec, row_spec,
                  full_spec(w_qkv), full_spec(w_fc), full_spec(w_ff1),
                  full_spec(w_ff2), full_spec(vec), full_spec(b_ff1)],
        out_specs=row_spec,
        out_shape=jax.ShapeDtypeStruct((BN * T, D), jnp.float32),
        compiler_params=pltpu.CompilerParams(
            dimension_semantics=("parallel",),
            vmem_limit_bytes=vmem_limit),
    )(xq2, xk2, xv2, w_qkv, w_fc, w_ff1, w_ff2, vec, b_ff1)

    return out.reshape(B, N, T, D)


def temporal_att_reference(xq, xk, xv, p, heads):
    """Pure-JAX reference mirroring the PyTorch forward (eval mode)."""
    B, N, T, D = xq.shape
    dq = D // heads

    def proj(x, w, b):
        return x @ w + b

    Q = proj(xq, p["wq"], p["bq"]).reshape(B, N, T, heads, dq).transpose(0, 1, 3, 2, 4)
    K = proj(xk, p["wk"], p["bk"]).reshape(B, N, T, heads, dq).transpose(0, 1, 3, 2, 4)
    V = proj(xv, p["wv"], p["bv"]).reshape(B, N, T, heads, dq).transpose(0, 1, 3, 2, 4)

    att = jnp.einsum("bnhtd,bnhsd->bnhts", Q, K) / math.sqrt(dq)
    att = jax.nn.softmax(att, axis=-1)
    ctx = jnp.einsum("bnhts,bnhsd->bnhtd", att, V)
    ctx = ctx.transpose(0, 1, 3, 2, 4).reshape(B, N, T, D)
    ctx = ctx @ p["wfc"] + p["bfc"]

    h1 = _layer_norm(ctx + xq, p["g1"], p["be1"])
    ff = jnp.maximum(h1 @ p["wff1"] + p["bff1"], 0.0) @ p["wff2"] + p["bff2"]
    return _layer_norm(ff + h1, p["g2"], p["be2"])


def make_params(key, hidden_size):
    D = hidden_size
    ks = jax.random.split(key, 12)
    s = 0.1

    def w(k, shape):
        return (s * jax.random.normal(k, shape)).astype(jnp.float32)

    return {
        "wq": w(ks[0], (D, D)),   "bq": w(ks[1], (1, D)),
        "wk": w(ks[2], (D, D)),   "bk": w(ks[3], (1, D)),
        "wv": w(ks[4], (D, D)),   "bv": w(ks[5], (1, D)),
        "wfc": w(ks[6], (D, D)),  "bfc": w(ks[7], (1, D)),
        "wff1": w(ks[8], (D, 2 * D)), "bff1": w(ks[9], (1, 2 * D)),
        "wff2": w(ks[10], (2 * D, D)), "bff2": w(ks[11], (1, D)),
        "g1": jnp.ones((1, D), jnp.float32),  "be1": jnp.zeros((1, D), jnp.float32),
        "g2": jnp.ones((1, D), jnp.float32),  "be2": jnp.zeros((1, D), jnp.float32),
    }


if __name__ == "__main__":
    # batch=2, max_num_object=3, num_historical_steps=8, hidden_size=32, heads=4
    B, N, T, D, heads = 2, 3, 8, 32, 4

    key = jax.random.PRNGKey(0)
    kq, kk, kv, kp = jax.random.split(key, 4)
    input_Q = jax.random.normal(kq, (B, N, T, D), jnp.float32)
    input_K = jax.random.normal(kk, (B, N, T, D), jnp.float32)
    input_V = jax.random.normal(kv, (B, N, T, D), jnp.float32)
    params = make_params(kp, D)

    # 1) Exact f32 path (tiny problem collapses to a single grid step).
    out = jax.block_until_ready(
        temporal_att_pallas(input_Q, input_K, input_V, params, heads,
                            fast_math=False))
    ref = temporal_att_reference(input_Q, input_K, input_V, params, heads)
    assert out.shape == (B, N, T, D)
    err = float(jnp.max(jnp.abs(out - ref)))
    assert jnp.allclose(out, ref, rtol=1e-3, atol=1e-3), f"f32 max abs err {err}"

    # 2) Multi-step grid + ragged last block: BN=135 with obj_block=32 ->
    #    6 steps of 23 objects (last step has 20 valid objects, 3 masked);
    #    no wrapper-side padding copy of the activations.
    B2, N2 = 3, 45
    kq2, kk2, kv2 = jax.random.split(jax.random.PRNGKey(1), 3)
    q2 = jax.random.normal(kq2, (B2, N2, T, D), jnp.float32)
    k2 = jax.random.normal(kk2, (B2, N2, T, D), jnp.float32)
    v2 = jax.random.normal(kv2, (B2, N2, T, D), jnp.float32)
    out2 = jax.block_until_ready(
        temporal_att_pallas(q2, k2, v2, params, heads, obj_block=32,
                            fast_math=False))
    ref2 = temporal_att_reference(q2, k2, v2, params, heads)
    err2 = float(jnp.max(jnp.abs(out2 - ref2)))
    assert jnp.allclose(out2, ref2, rtol=1e-3, atol=1e-3), \
        f"multi-step max abs err {err2}"

    # 3) Default fast-math path (bf16 MXU operands, f32 accumulation) with
    #    bf16 activations (halves activation DMA bytes).  Compared against the
    #    f32 reference evaluated on the same bf16-rounded inputs.
    q_bf, k_bf, v_bf = (x.astype(jnp.bfloat16)
                        for x in (input_Q, input_K, input_V))
    out_fast = jax.block_until_ready(
        temporal_att_pallas(q_bf, k_bf, v_bf, params, heads))
    ref_bf = temporal_att_reference(q_bf.astype(jnp.float32),
                                    k_bf.astype(jnp.float32),
                                    v_bf.astype(jnp.float32), params, heads)
    assert bool(jnp.all(jnp.isfinite(out_fast)))
    err_fast = float(jnp.max(jnp.abs(out_fast - ref_bf)))
    assert err_fast < 0.25, f"fast-math max abs err {err_fast}"

    print("KERNEL_OK")
</pallas_src>

<mosaic_0001>
module attributes {stable_mosaic.version = 11 : i64} {
  func.func @_temporal_att_kernel(%arg0: i32, %arg1: memref<48x32xf32, #tpu.memory_space<vmem>>, %arg2: memref<48x32xf32, #tpu.memory_space<vmem>>, %arg3: memref<48x32xf32, #tpu.memory_space<vmem>>, %arg4: memref<3x32x32xf32, #tpu.memory_space<vmem>>, %arg5: memref<32x32xf32, #tpu.memory_space<vmem>>, %arg6: memref<32x64xf32, #tpu.memory_space<vmem>>, %arg7: memref<64x32xf32, #tpu.memory_space<vmem>>, %arg8: memref<9x32xf32, #tpu.memory_space<vmem>>, %arg9: memref<1x64xf32, #tpu.memory_space<vmem>>, %arg10: memref<48x32xf32, #tpu.memory_space<vmem>>) attributes {dimension_semantics = [#tpu.dimension_semantics<parallel>], iteration_bounds = array<i64: 1>, scalar_prefetch = 0 : i64, scratch_operands = 0 : i64, tpu.core_type = #tpu.core_type<tc>, window_params = [{transform_indices = @transform_0, window_bounds = array<i64: 48, 32>}, {transform_indices = @transform_1, window_bounds = array<i64: 48, 32>}, {transform_indices = @transform_2, window_bounds = array<i64: 48, 32>}, {pipeline_mode = #tpu.pipeline_mode<synchronous>, transform_indices = @transform_3, window_bounds = array<i64: 3, 32, 32>}, {pipeline_mode = #tpu.pipeline_mode<synchronous>, transform_indices = @transform_4, window_bounds = array<i64: 32, 32>}, {pipeline_mode = #tpu.pipeline_mode<synchronous>, transform_indices = @transform_5, window_bounds = array<i64: 32, 64>}, {pipeline_mode = #tpu.pipeline_mode<synchronous>, transform_indices = @transform_6, window_bounds = array<i64: 64, 32>}, {pipeline_mode = #tpu.pipeline_mode<synchronous>, transform_indices = @transform_7, window_bounds = array<i64: 9, 32>}, {pipeline_mode = #tpu.pipeline_mode<synchronous>, transform_indices = @transform_8, window_bounds = array<i64: 1, 64>}, {transform_indices = @transform_9, window_bounds = array<i64: 48, 32>}]} {
    %c0 = arith.constant 0 : index
    %c0_0 = arith.constant 0 : index
    %0 = vector.load %arg1[%c0, %c0_0] : memref<48x32xf32, #tpu.memory_space<vmem>>, vector<48x32xf32>
    %c0_1 = arith.constant 0 : index
    %c0_2 = arith.constant 0 : index
    %1 = vector.load %arg8[%c0_1, %c0_2] : memref<9x32xf32, #tpu.memory_space<vmem>>, vector<9x32xf32>
    %2 = vector.extract_strided_slice %1 {offsets = [0, 0], sizes = [1, 32], strides = [1, 1]} : vector<9x32xf32> to vector<1x32xf32>
    %3 = vector.extract_strided_slice %1 {offsets = [1, 0], sizes = [1, 32], strides = [1, 1]} : vector<9x32xf32> to vector<1x32xf32>
    %4 = vector.extract_strided_slice %1 {offsets = [2, 0], sizes = [1, 32], strides = [1, 1]} : vector<9x32xf32> to vector<1x32xf32>
    %5 = vector.extract_strided_slice %1 {offsets = [3, 0], sizes = [1, 32], strides = [1, 1]} : vector<9x32xf32> to vector<1x32xf32>
    %6 = vector.extract_strided_slice %1 {offsets = [4, 0], sizes = [1, 32], strides = [1, 1]} : vector<9x32xf32> to vector<1x32xf32>
    %7 = vector.extract_strided_slice %1 {offsets = [5, 0], sizes = [1, 32], strides = [1, 1]} : vector<9x32xf32> to vector<1x32xf32>
    %8 = vector.extract_strided_slice %1 {offsets = [6, 0], sizes = [1, 32], strides = [1, 1]} : vector<9x32xf32> to vector<1x32xf32>
    %9 = vector.extract_strided_slice %1 {offsets = [7, 0], sizes = [1, 32], strides = [1, 1]} : vector<9x32xf32> to vector<1x32xf32>
    %10 = vector.extract_strided_slice %1 {offsets = [8, 0], sizes = [1, 32], strides = [1, 1]} : vector<9x32xf32> to vector<1x32xf32>
    %c0_3 = arith.constant 0 : index
    %c0_4 = arith.constant 0 : index
    %11 = vector.load %arg9[%c0_3, %c0_4] : memref<1x64xf32, #tpu.memory_space<vmem>>, vector<1x64xf32>
    %c0_5 = arith.constant 0 : index
    %c0_6 = arith.constant 0 : index
    %c0_7 = arith.constant 0 : index
    %12 = vector.load %arg4[%c0_5, %c0_6, %c0_7] : memref<3x32x32xf32, #tpu.memory_space<vmem>>, vector<1x32x32xf32>
    %13 = vector.shape_cast %12 : vector<1x32x32xf32> to vector<32x32xf32>
    %cst = arith.constant dense<0.000000e+00> : vector<48x32xf32>
    %14 = tpu.matmul %0, %13, %cst {dimension_numbers = #tpu.dot_dimension_numbers<[1], [0], [0], [1], [0, 0, 1, 1], [], []>} : vector<48x32xf32>, vector<32x32xf32>, vector<48x32xf32> -> vector<48x32xf32>
    %15 = vector.broadcast %2 : vector<1x32xf32> to vector<48x32xf32>
    %16 = arith.addf %14, %15 : vector<48x32xf32>
    %cst_8 = arith.constant 0.353553385 : f32
    %17 = vector.broadcast %cst_8 : f32 to vector<48x32xf32>
    %18 = arith.mulf %16, %17 : vector<48x32xf32>
    %c0_9 = arith.constant 0 : index
    %c0_10 = arith.constant 0 : index
    %19 = vector.load %arg2[%c0_9, %c0_10] : memref<48x32xf32, #tpu.memory_space<vmem>>, vector<48x32xf32>
    %c1 = arith.constant 1 : index
    %c0_11 = arith.constant 0 : index
    %c0_12 = arith.constant 0 : index
    %20 = vector.load %arg4[%c1, %c0_11, %c0_12] : memref<3x32x32xf32, #tpu.memory_space<vmem>>, vector<1x32x32xf32>
    %21 = vector.shape_cast %20 : vector<1x32x32xf32> to vector<32x32xf32>
    %cst_13 = arith.constant dense<0.000000e+00> : vector<48x32xf32>
    %22 = tpu.matmul %19, %21, %cst_13 {dimension_numbers = #tpu.dot_dimension_numbers<[1], [0], [0], [1], [0, 0, 1, 1], [], []>} : vector<48x32xf32>, vector<32x32xf32>, vector<48x32xf32> -> vector<48x32xf32>
    %23 = vector.broadcast %3 : vector<1x32xf32> to vector<48x32xf32>
    %24 = arith.addf %22, %23 : vector<48x32xf32>
    %c0_14 = arith.constant 0 : index
    %c0_15 = arith.constant 0 : index
    %25 = vector.load %arg3[%c0_14, %c0_15] : memref<48x32xf32, #tpu.memory_space<vmem>>, vector<48x32xf32>
    %c2 = arith.constant 2 : index
    %c0_16 = arith.constant 0 : index
    %c0_17 = arith.constant 0 : index
    %26 = vector.load %arg4[%c2, %c0_16, %c0_17] : memref<3x32x32xf32, #tpu.memory_space<vmem>>, vector<1x32x32xf32>
    %27 = vector.shape_cast %26 : vector<1x32x32xf32> to vector<32x32xf32>
    %cst_18 = arith.constant dense<0.000000e+00> : vector<48x32xf32>
    %28 = tpu.matmul %25, %27, %cst_18 {dimension_numbers = #tpu.dot_dimension_numbers<[1], [0], [0], [1], [0, 0, 1, 1], [], []>} : vector<48x32xf32>, vector<32x32xf32>, vector<48x32xf32> -> vector<48x32xf32>
    %29 = vector.broadcast %4 : vector<1x32xf32> to vector<48x32xf32>
    %30 = arith.addf %28, %29 : vector<48x32xf32>
    %31 = vector.shape_cast %18 : vector<48x32xf32> to vector<6x8x32xf32>
    %32 = vector.shape_cast %24 : vector<48x32xf32> to vector<6x8x32xf32>
    %33 = vector.shape_cast %30 : vector<48x32xf32> to vector<6x8x32xf32>
    %34 = vector.extract_strided_slice %31 {offsets = [0, 0, 0], sizes = [6, 8, 8], strides = [1, 1, 1]} : vector<6x8x32xf32> to vector<6x8x8xf32>
    %35 = vector.extract_strided_slice %32 {offsets = [0, 0, 0], sizes = [6, 8, 8], strides = [1, 1, 1]} : vector<6x8x32xf32> to vector<6x8x8xf32>
    %36 = vector.extract_strided_slice %33 {offsets = [0, 0, 0], sizes = [6, 8, 8], strides = [1, 1, 1]} : vector<6x8x32xf32> to vector<6x8x8xf32>
    "tpu.trace_start"() <{level = 10 : i32, message = "btd,bsd->bts"}> : () -> ()
    %cst_19 = arith.constant dense<0.000000e+00> : vector<6x8x8xf32>
    %37 = tpu.matmul %34, %35, %cst_19 {dimension_numbers = #tpu.dot_dimension_numbers<[2], [2], [1], [1], [0, 0, 0, 1, 1, 1], [0], [0]>} : vector<6x8x8xf32>, vector<6x8x8xf32>, vector<6x8x8xf32> -> vector<6x8x8xf32>
    "tpu.trace_stop"() : () -> ()
    %cst_20 = arith.constant dense<0xFF800000> : vector<6x8xf32>
    %38 = vector.multi_reduction <maximumf>, %37, %cst_20 [2] : vector<6x8x8xf32> to vector<6x8xf32>
    %39 = vector.shape_cast %38 : vector<6x8xf32> to vector<6x8x1xf32>
    %40 = vector.broadcast %39 : vector<6x8x1xf32> to vector<6x8x8xf32>
    %41 = arith.subf %37, %40 : vector<6x8x8xf32>
    %42 = math.exp %41 : vector<6x8x8xf32>
    %cst_21 = arith.constant dense<0.000000e+00> : vector<6x8xf32>
    %43 = vector.multi_reduction <add>, %42, %cst_21 [2] : vector<6x8x8xf32> to vector<6x8xf32>
    %44 = vector.shape_cast %43 : vector<6x8xf32> to vector<6x8x1xf32>
    %45 = vector.broadcast %44 : vector<6x8x1xf32> to vector<6x8x8xf32>
    %46 = arith.divf %42, %45 : vector<6x8x8xf32>
    "tpu.trace_start"() <{level = 10 : i32, message = "bts,bsd->btd"}> : () -> ()
    %cst_22 = arith.constant dense<0.000000e+00> : vector<6x8x8xf32>
    %47 = tpu.matmul %46, %36, %cst_22 {dimension_numbers = #tpu.dot_dimension_numbers<[2], [1], [1], [2], [0, 0, 0, 1, 1, 2], [0], [0]>} : vector<6x8x8xf32>, vector<6x8x8xf32>, vector<6x8x8xf32> -> vector<6x8x8xf32>
    "tpu.trace_stop"() : () -> ()
    %48 = vector.extract_strided_slice %31 {offsets = [0, 0, 8], sizes = [6, 8, 8], strides = [1, 1, 1]} : vector<6x8x32xf32> to vector<6x8x8xf32>
    %49 = vector.extract_strided_slice %32 {offsets = [0, 0, 8], sizes = [6, 8, 8], strides = [1, 1, 1]} : vector<6x8x32xf32> to vector<6x8x8xf32>
    %50 = vector.extract_strided_slice %33 {offsets = [0, 0, 8], sizes = [6, 8, 8], strides = [1, 1, 1]} : vector<6x8x32xf32> to vector<6x8x8xf32>
    "tpu.trace_start"() <{level = 10 : i32, message = "btd,bsd->bts"}> : () -> ()
    %cst_23 = arith.constant dense<0.000000e+00> : vector<6x8x8xf32>
    %51 = tpu.matmul %48, %49, %cst_23 {dimension_numbers = #tpu.dot_dimension_numbers<[2], [2], [1], [1], [0, 0, 0, 1, 1, 1], [0], [0]>} : vector<6x8x8xf32>, vector<6x8x8xf32>, vector<6x8x8xf32> -> vector<6x8x8xf32>
    "tpu.trace_stop"() : () -> ()
    %cst_24 = arith.constant dense<0xFF800000> : vector<6x8xf32>
    %52 = vector.multi_reduction <maximumf>, %51, %cst_24 [2] : vector<6x8x8xf32> to vector<6x8xf32>
    %53 = vector.shape_cast %52 : vector<6x8xf32> to vector<6x8x1xf32>
    %54 = vector.broadcast %53 : vector<6x8x1xf32> to vector<6x8x8xf32>
    %55 = arith.subf %51, %54 : vector<6x8x8xf32>
    %56 = math.exp %55 : vector<6x8x8xf32>
    %cst_25 = arith.constant dense<0.000000e+00> : vector<6x8xf32>
    %57 = vector.multi_reduction <add>, %56, %cst_25 [2] : vector<6x8x8xf32> to vector<6x8xf32>
    %58 = vector.shape_cast %57 : vector<6x8xf32> to vector<6x8x1xf32>
    %59 = vector.broadcast %58 : vector<6x8x1xf32> to vector<6x8x8xf32>
    %60 = arith.divf %56, %59 : vector<6x8x8xf32>
    "tpu.trace_start"() <{level = 10 : i32, message = "bts,bsd->btd"}> : () -> ()
    %cst_26 = arith.constant dense<0.000000e+00> : vector<6x8x8xf32>
    %61 = tpu.matmul %60, %50, %cst_26 {dimension_numbers = #tpu.dot_dimension_numbers<[2], [1], [1], [2], [0, 0, 0, 1, 1, 2], [0], [0]>} : vector<6x8x8xf32>, vector<6x8x8xf32>, vector<6x8x8xf32> -> vector<6x8x8xf32>
    "tpu.trace_stop"() : () -> ()
    %62 = vector.extract_strided_slice %31 {offsets = [0, 0, 16], sizes = [6, 8, 8], strides = [1, 1, 1]} : vector<6x8x32xf32> to vector<6x8x8xf32>
    %63 = vector.extract_strided_slice %32 {offsets = [0, 0, 16], sizes = [6, 8, 8], strides = [1, 1, 1]} : vector<6x8x32xf32> to vector<6x8x8xf32>
    %64 = vector.extract_strided_slice %33 {offsets = [0, 0, 16], sizes = [6, 8, 8], strides = [1, 1, 1]} : vector<6x8x32xf32> to vector<6x8x8xf32>
    "tpu.trace_start"() <{level = 10 : i32, message = "btd,bsd->bts"}> : () -> ()
    %cst_27 = arith.constant dense<0.000000e+00> : vector<6x8x8xf32>
    %65 = tpu.matmul %62, %63, %cst_27 {dimension_numbers = #tpu.dot_dimension_numbers<[2], [2], [1], [1], [0, 0, 0, 1, 1, 1], [0], [0]>} : vector<6x8x8xf32>, vector<6x8x8xf32>, vector<6x8x8xf32> -> vector<6x8x8xf32>
    "tpu.trace_stop"() : () -> ()
    %cst_28 = arith.constant dense<0xFF800000> : vector<6x8xf32>
    %66 = vector.multi_reduction <maximumf>, %65, %cst_28 [2] : vector<6x8x8xf32> to vector<6x8xf32>
    %67 = vector.shape_cast %66 : vector<6x8xf32> to vector<6x8x1xf32>
    %68 = vector.broadcast %67 : vector<6x8x1xf32> to vector<6x8x8xf32>
    %69 = arith.subf %65, %68 : vector<6x8x8xf32>
    %70 = math.exp %69 : vector<6x8x8xf32>
    %cst_29 = arith.constant dense<0.000000e+00> : vector<6x8xf32>
    %71 = vector.multi_reduction <add>, %70, %cst_29 [2] : vector<6x8x8xf32> to vector<6x8xf32>
    %72 = vector.shape_cast %71 : vector<6x8xf32> to vector<6x8x1xf32>
    %73 = vector.broadcast %72 : vector<6x8x1xf32> to vector<6x8x8xf32>
    %74 = arith.divf %70, %73 : vector<6x8x8xf32>
    "tpu.trace_start"() <{level = 10 : i32, message = "bts,bsd->btd"}> : () -> ()
    %cst_30 = arith.constant dense<0.000000e+00> : vector<6x8x8xf32>
    %75 = tpu.matmul %74, %64, %cst_30 {dimension_numbers = #tpu.dot_dimension_numbers<[2], [1], [1], [2], [0, 0, 0, 1, 1, 2], [0], [0]>} : vector<6x8x8xf32>, vector<6x8x8xf32>, vector<6x8x8xf32> -> vector<6x8x8xf32>
    "tpu.trace_stop"() : () -> ()
    %76 = vector.extract_strided_slice %31 {offsets = [0, 0, 24], sizes = [6, 8, 8], strides = [1, 1, 1]} : vector<6x8x32xf32> to vector<6x8x8xf32>
    %77 = vector.extract_strided_slice %32 {offsets = [0, 0, 24], sizes = [6, 8, 8], strides = [1, 1, 1]} : vector<6x8x32xf32> to vector<6x8x8xf32>
    %78 = vector.extract_strided_slice %33 {offsets = [0, 0, 24], sizes = [6, 8, 8], strides = [1, 1, 1]} : vector<6x8x32xf32> to vector<6x8x8xf32>
    "tpu.trace_start"() <{level = 10 : i32, message = "btd,bsd->bts"}> : () -> ()
    %cst_31 = arith.constant dense<0.000000e+00> : vector<6x8x8xf32>
    %79 = tpu.matmul %76, %77, %cst_31 {dimension_numbers = #tpu.dot_dimension_numbers<[2], [2], [1], [1], [0, 0, 0, 1, 1, 1], [0], [0]>} : vector<6x8x8xf32>, vector<6x8x8xf32>, vector<6x8x8xf32> -> vector<6x8x8xf32>
    "tpu.trace_stop"() : () -> ()
    %cst_32 = arith.constant dense<0xFF800000> : vector<6x8xf32>
    %80 = vector.multi_reduction <maximumf>, %79, %cst_32 [2] : vector<6x8x8xf32> to vector<6x8xf32>
    %81 = vector.shape_cast %80 : vector<6x8xf32> to vector<6x8x1xf32>
    %82 = vector.broadcast %81 : vector<6x8x1xf32> to vector<6x8x8xf32>
    %83 = arith.subf %79, %82 : vector<6x8x8xf32>
    %84 = math.exp %83 : vector<6x8x8xf32>
    %cst_33 = arith.constant dense<0.000000e+00> : vector<6x8xf32>
    %85 = vector.multi_reduction <add>, %84, %cst_33 [2] : vector<6x8x8xf32> to vector<6x8xf32>
    %86 = vector.shape_cast %85 : vector<6x8xf32> to vector<6x8x1xf32>
    %87 = vector.broadcast %86 : vector<6x8x1xf32> to vector<6x8x8xf32>
    %88 = arith.divf %84, %87 : vector<6x8x8xf32>
    "tpu.trace_start"() <{level = 10 : i32, message = "bts,bsd->btd"}> : () -> ()
    %cst_34 = arith.constant dense<0.000000e+00> : vector<6x8x8xf32>
    %89 = tpu.matmul %88, %78, %cst_34 {dimension_numbers = #tpu.dot_dimension_numbers<[2], [1], [1], [2], [0, 0, 0, 1, 1, 2], [0], [0]>} : vector<6x8x8xf32>, vector<6x8x8xf32>, vector<6x8x8xf32> -> vector<6x8x8xf32>
    "tpu.trace_stop"() : () -> ()
    %90 = tpu.concatenate %47, %61, %75, %89 in 2 : vector<6x8x8xf32>, vector<6x8x8xf32>, vector<6x8x8xf32>, vector<6x8x8xf32> -> vector<6x8x32xf32>
    %91 = vector.shape_cast %90 : vector<6x8x32xf32> to vector<48x32xf32>
    %c0_35 = arith.constant 0 : index
    %c0_36 = arith.constant 0 : index
    %92 = vector.load %arg5[%c0_35, %c0_36] : memref<32x32xf32, #tpu.memory_space<vmem>>, vector<32x32xf32>
    %cst_37 = arith.constant dense<0.000000e+00> : vector<48x32xf32>
    %93 = tpu.matmul %91, %92, %cst_37 {dimension_numbers = #tpu.dot_dimension_numbers<[1], [0], [0], [1], [0, 0, 1, 1], [], []>} : vector<48x32xf32>, vector<32x32xf32>, vector<48x32xf32> -> vector<48x32xf32>
    %94 = vector.broadcast %5 : vector<1x32xf32> to vector<48x32xf32>
    %95 = arith.addf %93, %94 : vector<48x32xf32>
    %96 = arith.addf %95, %0 : vector<48x32xf32>
    %cst_38 = arith.constant dense<0.000000e+00> : vector<48xf32>
    %97 = vector.multi_reduction <add>, %96, %cst_38 [1] : vector<48x32xf32> to vector<48xf32>
    %98 = vector.shape_cast %97 : vector<48xf32> to vector<48x1xf32>
    %cst_39 = arith.constant 3.200000e+01 : f32
    %99 = vector.broadcast %cst_39 : f32 to vector<48x1xf32>
    %100 = arith.divf %98, %99 : vector<48x1xf32>
    %101 = vector.broadcast %100 : vector<48x1xf32> to vector<48x32xf32>
    %102 = arith.subf %96, %101 : vector<48x32xf32>
    %103 = arith.mulf %102, %102 : vector<48x32xf32>
    %cst_40 = arith.constant dense<0.000000e+00> : vector<48xf32>
    %104 = vector.multi_reduction <add>, %103, %cst_40 [1] : vector<48x32xf32> to vector<48xf32>
    %105 = vector.shape_cast %104 : vector<48xf32> to vector<48x1xf32>
    %cst_41 = arith.constant 3.200000e+01 : f32
    %106 = vector.broadcast %cst_41 : f32 to vector<48x1xf32>
    %107 = arith.divf %105, %106 : vector<48x1xf32>
    %108 = vector.broadcast %100 : vector<48x1xf32> to vector<48x32xf32>
    %109 = arith.subf %96, %108 : vector<48x32xf32>
    %cst_42 = arith.constant 9.99999974E-6 : f32
    %110 = vector.broadcast %cst_42 : f32 to vector<48x1xf32>
    %111 = arith.addf %107, %110 : vector<48x1xf32>
    %112 = math.rsqrt %111 : vector<48x1xf32>
    %113 = vector.broadcast %112 : vector<48x1xf32> to vector<48x32xf32>
    %114 = arith.mulf %109, %113 : vector<48x32xf32>
    %115 = vector.broadcast %6 : vector<1x32xf32> to vector<48x32xf32>
    %116 = arith.mulf %114, %115 : vector<48x32xf32>
    %117 = vector.broadcast %7 : vector<1x32xf32> to vector<48x32xf32>
    %118 = arith.addf %116, %117 : vector<48x32xf32>
    %c0_43 = arith.constant 0 : index
    %c0_44 = arith.constant 0 : index
    %119 = vector.load %arg6[%c0_43, %c0_44] : memref<32x64xf32, #tpu.memory_space<vmem>>, vector<32x64xf32>
    %cst_45 = arith.constant dense<0.000000e+00> : vector<48x64xf32>
    %120 = tpu.matmul %118, %119, %cst_45 {dimension_numbers = #tpu.dot_dimension_numbers<[1], [0], [0], [1], [0, 0, 1, 1], [], []>} : vector<48x32xf32>, vector<32x64xf32>, vector<48x64xf32> -> vector<48x64xf32>
    %121 = vector.broadcast %11 : vector<1x64xf32> to vector<48x64xf32>
    %122 = arith.addf %120, %121 : vector<48x64xf32>
    %cst_46 = arith.constant 0.000000e+00 : f32
    %123 = vector.broadcast %cst_46 : f32 to vector<48x64xf32>
    %124 = arith.maximumf %122, %123 : vector<48x64xf32>
    %c0_47 = arith.constant 0 : index
    %c0_48 = arith.constant 0 : index
    %125 = vector.load %arg7[%c0_47, %c0_48] : memref<64x32xf32, #tpu.memory_space<vmem>>, vector<64x32xf32>
    %cst_49 = arith.constant dense<0.000000e+00> : vector<48x32xf32>
    %126 = tpu.matmul %124, %125, %cst_49 {dimension_numbers = #tpu.dot_dimension_numbers<[1], [0], [0], [1], [0, 0, 1, 1], [], []>} : vector<48x64xf32>, vector<64x32xf32>, vector<48x32xf32> -> vector<48x32xf32>
    %127 = vector.broadcast %8 : vector<1x32xf32> to vector<48x32xf32>
    %128 = arith.addf %126, %127 : vector<48x32xf32>
    %129 = arith.addf %128, %118 : vector<48x32xf32>
    %cst_50 = arith.constant dense<0.000000e+00> : vector<48xf32>
    %130 = vector.multi_reduction <add>, %129, %cst_50 [1] : vector<48x32xf32> to vector<48xf32>
    %131 = vector.shape_cast %130 : vector<48xf32> to vector<48x1xf32>
    %cst_51 = arith.constant 3.200000e+01 : f32
    %132 = vector.broadcast %cst_51 : f32 to vector<48x1xf32>
    %133 = arith.divf %131, %132 : vector<48x1xf32>
    %134 = vector.broadcast %133 : vector<48x1xf32> to vector<48x32xf32>
    %135 = arith.subf %129, %134 : vector<48x32xf32>
    %136 = arith.mulf %135, %135 : vector<48x32xf32>
    %cst_52 = arith.constant dense<0.000000e+00> : vector<48xf32>
    %137 = vector.multi_reduction <add>, %136, %cst_52 [1] : vector<48x32xf32> to vector<48xf32>
    %138 = vector.shape_cast %137 : vector<48xf32> to vector<48x1xf32>
    %cst_53 = arith.constant 3.200000e+01 : f32
    %139 = vector.broadcast %cst_53 : f32 to vector<48x1xf32>
    %140 = arith.divf %138, %139 : vector<48x1xf32>
    %141 = vector.broadcast %133 : vector<48x1xf32> to vector<48x32xf32>
    %142 = arith.subf %129, %141 : vector<48x32xf32>
    %cst_54 = arith.constant 9.99999974E-6 : f32
    %143 = vector.broadcast %cst_54 : f32 to vector<48x1xf32>
    %144 = arith.addf %140, %143 : vector<48x1xf32>
    %145 = math.rsqrt %144 : vector<48x1xf32>
    %146 = vector.broadcast %145 : vector<48x1xf32> to vector<48x32xf32>
    %147 = arith.mulf %142, %146 : vector<48x32xf32>
    %148 = vector.broadcast %9 : vector<1x32xf32> to vector<48x32xf32>
    %149 = arith.mulf %147, %148 : vector<48x32xf32>
    %150 = vector.broadcast %10 : vector<1x32xf32> to vector<48x32xf32>
    %151 = arith.addf %149, %150 : vector<48x32xf32>
    %c0_55 = arith.constant 0 : index
    %c0_56 = arith.constant 0 : index
    %152 = vector.load %arg10[%c0_55, %c0_56] : memref<48x32xf32, #tpu.memory_space<vmem>>, vector<48x32xf32>
    tpu.vector_store %arg10[%c0_55, %c0_56], %151 {strides = array<i32>} : memref<48x32xf32, #tpu.memory_space<vmem>>, vector<48x32xf32>,
    return
  }
  func.func @transform_0(%arg0: i32) -> (i32, i32) {
    %c0_i32 = arith.constant 0 : i32
    %c0_i32_0 = arith.constant 0 : i32
    return %arg0, %c0_i32 : i32, i32
  }
  func.func @transform_1(%arg0: i32) -> (i32, i32) {
    %c0_i32 = arith.constant 0 : i32
    %c0_i32_0 = arith.constant 0 : i32
    return %arg0, %c0_i32 : i32, i32
  }
  func.func @transform_2(%arg0: i32) -> (i32, i32) {
    %c0_i32 = arith.constant 0 : i32
    %c0_i32_0 = arith.constant 0 : i32
    return %arg0, %c0_i32 : i32, i32
  }
  func.func @transform_3(%arg0: i32) -> (i32, i32, i32) {
    %c0_i32 = arith.constant 0 : i32
    %c0_i32_0 = arith.constant 0 : i32
    %c0_i32_1 = arith.constant 0 : i32
    %c0_i32_2 = arith.constant 0 : i32
    return %c0_i32, %c0_i32_0, %c0_i32_1 : i32, i32, i32
  }
  func.func @transform_4(%arg0: i32) -> (i32, i32) {
    %c0_i32 = arith.constant 0 : i32
    %c0_i32_0 = arith.constant 0 : i32
    %c0_i32_1 = arith.constant 0 : i32
    return %c0_i32, %c0_i32_0 : i32, i32
  }
  func.func @transform_5(%arg0: i32) -> (i32, i32) {
    %c0_i32 = arith.constant 0 : i32
    %c0_i32_0 = arith.constant 0 : i32
    %c0_i32_1 = arith.constant 0 : i32
    return %c0_i32, %c0_i32_0 : i32, i32
  }
  func.func @transform_6(%arg0: i32) -> (i32, i32) {
    %c0_i32 = arith.constant 0 : i32
    %c0_i32_0 = arith.constant 0 : i32
    %c0_i32_1 = arith.constant 0 : i32
    return %c0_i32, %c0_i32_0 : i32, i32
  }
  func.func @transform_7(%arg0: i32) -> (i32, i32) {
    %c0_i32 = arith.constant 0 : i32
    %c0_i32_0 = arith.constant 0 : i32
    %c0_i32_1 = arith.constant 0 : i32
    return %c0_i32, %c0_i32_0 : i32, i32
  }
  func.func @transform_8(%arg0: i32) -> (i32, i32) {
    %c0_i32 = arith.constant 0 : i32
    %c0_i32_0 = arith.constant 0 : i32
    %c0_i32_1 = arith.constant 0 : i32
    return %c0_i32, %c0_i32_0 : i32, i32
  }
  func.func @transform_9(%arg0: i32) -> (i32, i32) {
    %c0_i32 = arith.constant 0 : i32
    %c0_i32_0 = arith.constant 0 : i32
    return %arg0, %c0_i32 : i32, i32
  }
}

</mosaic_0001>

<bundles_post_ra>
// kernel: tpu_custom_call.1
= control target key start
LH: loop header
LB: loop body
LE: loop exit
PB: predicated region body
PF: predicated region fallthrough
CT: control target
= control target key end

     0   :  { %vm49_vm0 = vcmask 261120   ;;  %v5872_v34 = vmov 0.0   ;;  %vm5873_vm1 = vmmov 0   ;;  %v45_v37 = vlaneseq  ;;  %s5874_s26 = smov 120   ;;  %s5875_s27 = smov 112   ;;  %s6820_s3 = inlined_call_operand.vmem [shape: f32[3,32,32], index: 3, kind: input, shape index: {}]   ;;  %s6821_s0 = inlined_call_operand.vmem [shape: f32[48,32], index: 0, kind: input, shape index: {}]   ;;  %s6822_s1 = inlined_call_operand.vmem [shape: f32[48,32], index: 1, kind: input, shape index: {}]   ;;  %s6823_s2 = inlined_call_operand.vmem [shape: f32[48,32], index: 2, kind: input, shape index: {}]   ;;  %s6824_s7 = inlined_call_operand.vmem [shape: f32[9,32], index: 7, kind: input, shape index: {}]   ;;  %s6825_s4 = inlined_call_operand.vmem [shape: f32[32,32], index: 4, kind: input, shape index: {}]   ;;  %s6826_s5 = inlined_call_operand.vmem [shape: f32[32,64], index: 5, kind: input, shape index: {}]   ;;  %s6827_s6 = inlined_call_operand.vmem [shape: f32[64,32], index: 6, kind: input, shape index: {}]   ;;  %s6828_s8 = inlined_call_operand.vmem [shape: f32[1,64], index: 8, kind: input, shape index: {}]   ;;  %s6829_s9 = inlined_call_operand.vmem [shape: f32[48,32], index: 9, kind: output, shape index: {}]  }
   0x1   :  { %v41_v0 = vld [vmem:[%s6820_s3] sm:$0xff]  ;;  %v42_v1 = vld [vmem:[%s6820_s3 + $0x8] sm:$0xff]  ;;  %v43_v2 = vld [vmem:[%s6820_s3 + $0x10] sm:$0xff]  ;;  %vm425_vm2 = vcmask 64512   ;;  %s5876_s28 = smov 104   ;;  %s5877_s29 = smov 8  }
   0x2   :  { %v5677_v3 = vpack.c.bf16 %v42_v1, %v41_v0  ;;  %v44_v4 = vld [vmem:[%s6820_s3 + $0x18] sm:$0xff]  ;;  %v32_v5 = vld [vmem:[%s6821_s0] sm:$0xff]  ;;  %v5056_v8 = vld [vmem:[%s6820_s3 + $0x28] sm:$0xff]  ;;  %v6044_v39 = vshrl.u32 %v45_v37, 7  ;;  %s5878_s30 = smov 16   ;;  %vm4440_vm3 = vcmask 130048  }
   0x3   :  { %v5681_v6 = vpack.c.bf16 %v44_v4, %v43_v2  ;;  %5335 = vmatprep.mubr.msk.f32.mxu0 %vm49_vm0, %v32_v5  ;;  %v5055_v7 = vld [vmem:[%s6820_s3 + $0x20] sm:$0xff]  ;;  %v5057_v10 = vld [vmem:[%s6820_s3 + $0x30] sm:$0xff]  ;;  %v5058_v11 = vld [vmem:[%s6820_s3 + $0x38] sm:$0xff]  ;;  %s5879_s17 = smov 24   ;;  %vm4447_vm4 = vcmask 195584   ;;  %vm4821_vm5 = vcmask 523264  }
   0x4   :  { %5678 = vmatprep.subr.bf16.mxu0 %v5677_v3  ;;  %v5685_v9 = vpack.c.bf16 %v5056_v8, %v5055_v7  ;;  %v5689_v12 = vpack.c.bf16 %v5058_v11, %v5057_v10  ;;  %v173_v13 = vld [vmem:[%s6822_s1 + $0x20] sm:$0xff]  ;;  %v33_v14 = vld [vmem:[%s6821_s0 + $0x8] sm:$0xff]  ;;  %v34_v15 = vld [vmem:[%s6821_s0 + $0x10] sm:$0xff]  ;;  %v47_v44 = vsub.s32 0, %v6044_v39  ;;  %v182_v47 = vsub.s32 1, %v6044_v39 }
   0x5   :  { %5680 = vmatpush3.bf16.msra.mxu0 %v5677_v3  ;;  %5358 = vmatprep.mubr.msk.f32.mxu1 %vm49_vm0, %v173_v13  ;;  %v174_v16 = vld [vmem:[%s6822_s1 + $0x28] sm:$0xff]  ;;  %v35_v17 = vld [vmem:[%s6821_s0 + $0x18] sm:$0xff]  ;;  %v36_v18 = vld [vmem:[%s6821_s0 + $0x20] sm:$0xff]  ;;  %v310_v10 = vsub.s32 2, %v6044_v39 }
   0x6   :  { %5682 = vmatprep.subr.bf16.mxu0 %v5681_v6  ;;  %5733 = vmatprep.subr.bf16.mxu1 %v5685_v9  ;;  %v37_v19 = vld [vmem:[%s6821_s0 + $0x28] sm:$0xff]  ;;  %v169_v20 = vld [vmem:[%s6822_s1] sm:$0xff]  ;;  %v171_v22 = vld [vmem:[%s6822_s1 + $0x10] sm:$0xff] }
   0x7   :  { %5735 = vmatpush3.bf16.msra.mxu1 %v5685_v9  ;;  %v170_v21 = vld [vmem:[%s6822_s1 + $0x8] sm:$0xff]  ;;  %v172_v23 = vld [vmem:[%s6822_s1 + $0x18] sm:$0xff]  ;;  %v5065_v24 = vld [vmem:[%s6820_s3 + $0x40] sm:$0xff] }
   0x8   :  { %5734 = vmatprep.subr.bf16.mxu1 %v5689_v12  ;;  %v5066_v25 = vld [vmem:[%s6820_s3 + $0x48] sm:$0xff]  ;;  %v5067_v27 = vld [vmem:[%s6820_s3 + $0x50] sm:$0xff]  ;;  %v5068_v28 = vld [vmem:[%s6820_s3 + $0x58] sm:$0xff] }
   0x9   :  { %5684 = vmatpush3.bf16.msra.mxu0 %v5681_v6  ;;  %v5693_v26 = vpack.c.bf16 %v5066_v25, %v5065_v24  ;;  %v5697_v29 = vpack.c.bf16 %v5068_v28, %v5067_v27  ;;  %v297_v30 = vld [vmem:[%s6823_s2] sm:$0xff]  ;;  %v298_v31 = vld [vmem:[%s6823_s2 + $0x8] sm:$0xff]  ;;  %v299_v32 = vld [vmem:[%s6823_s2 + $0x10] sm:$0xff] }
   0xa   :  { %5686 = vmatprep.subr.bf16.mxu0 %v5685_v9  ;;  %v300_v33 = vld [vmem:[%s6823_s2 + $0x18] sm:$0xff]  ;;  %v301_v35 = vld [vmem:[%s6823_s2 + $0x20] sm:$0xff]  ;;  %v302_v36 = vld [vmem:[%s6823_s2 + $0x28] sm:$0xff] }
   0xb   :  { %5736 = vmatpush3.bf16.msra.mxu1 %v5689_v12  ;;  %v38_v46 = vld [vmem:[%s6824_s7] sm:$0xff] }
   0xc   :  { %5336 = vmatmul.mubr.msk.f32.vlgmr.msra.gmra.mrb[0].mxu0 %vm49_vm0, %v33_v14  ;;  %5378 = vmatprep.subr.mxu1 %v5872_v34  ;;  %v48_v49 = vrot.slane %v38_v46, %v47_v44  ;;  %v183_v51 = vrot.slane %v38_v46, %v182_v47  ;;  %v311_v11 = vrot.slane %v38_v46, %v310_v10 }
   0xd   :  { %5688 = vmatpush3.bf16.msra.mxu0 %v5685_v9  ;;  %5338 = vmatprep.mubr.msk.f32.mxu0 %vm49_vm0, %v34_v15 }
   0xe   :  { %5690 = vmatprep.subr.bf16.mxu0 %v5689_v12  ;;  %5359 = vmatmul.mubr.msk.f32.vlgmr.msra.gmra.mrb[0].mxu1 %vm49_vm0, %v174_v16 }
   0xf   :  { %5380 = vmatprep.mubr.msk.f32.mxu1 %vm5873_vm1, %v5872_v34 }
  0x10   :  { %5339 = vmatmul.mubr.msk.f32.gmra.mrb[2].mxu0 %vm49_vm0, %v35_v17 }
  0x11   :  { %5341 = vmatprep.mubr.msk.f32.mxu0 %vm49_vm0, %v36_v18  ;;  %5692 = vmatpush3.bf16.msra.mxu0 %v5689_v12 }
  0x12   :  { %5694 = vmatprep.subr.bf16.mxu0 %v5693_v26 }
  0x14   :  { %5342 = vmatmul.mubr.msk.f32.gmra.mrb[4].mxu0 %vm49_vm0, %v37_v19 }
  0x15   :  { %5352 = vmatprep.mubr.msk.f32.mxu0 %vm49_vm0, %v169_v20 }
  0x18   :  { %5353 = vmatmul.mubr.msk.f32.vlgmr.msra.gmra.mrb[6].mxu0 %vm49_vm0, %v170_v21 }
  0x19   :  { %5355 = vmatprep.mubr.msk.f32.mxu0 %vm49_vm0, %v171_v22  ;;  %5696 = vmatpush3.bf16.msra.mxu0 %v5693_v26 }
  0x1a   :  { %5698 = vmatprep.subr.bf16.mxu0 %v5697_v29 }
  0x1c   :  { %5356 = vmatmul.mubr.msk.f32.gmra.mrb[8].mxu0 %vm49_vm0, %v172_v23 }
  0x1d   :  { %5700 = vmatpush3.bf16.msra.mxu0 %v5697_v29  ;;  %5369 = vmatprep.mubr.msk.f32.mxu0 %vm49_vm0, %v297_v30 }
  0x1e   :  { %5393 = vmatprep.subr.mxu0 %v5872_v34 }
  0x20   :  { %5370 = vmatmul.mubr.msk.f32.vlgmr.msra.gmra.mrb[10].mxu0 %vm49_vm0, %v298_v31 }
  0x21   :  { %5372 = vmatprep.mubr.msk.f32.mxu0 %vm49_vm0, %v299_v32 }
  0x24   :  { %5373 = vmatmul.mubr.msk.f32.gmra.mrb[12].mxu0 %vm49_vm0, %v300_v33 }
  0x25   :  { %5375 = vmatprep.mubr.msk.f32.mxu0 %vm49_vm0, %v301_v35 }
  0x28   :  { %5376 = vmatmul.mubr.msk.f32.gmra.mrb[14].mxu0 %vm49_vm0, %v302_v36 }
  0x29   :  { %5395 = vmatprep.mubr.msk.f32.mxu0 %vm5873_vm1, %v5872_v34 }
  0xdf   :  { %v5337_v38 = vpop.f32.mrb[0].mxu0 }
  0xe0   :  { %v134_v40 = vpop.f32.mrb[1].mxu0  ;;  %v140_v58 = vadd.f32 %v5337_v38, %v48_v49 }
  0xe1   :  { %v5360_v41 = vpop.f32.mrb[0].mxu1  ;;  %v135_v53 = vadd.f32 %v134_v40, %v48_v49 }
  0xe2   :  { %v288_v42 = vpop.f32.mrb[1].mxu1  ;;  %v6066_v63 = vadd.f32 %v5360_v41, %v183_v51  ;;  %v6076_v3 = vmul.f32 0.35355338, %v140_v58 }
  0xe3   :  { %v5340_v43 = vpop.f32.mrb[2].mxu0  ;;  %v6055_v59 = vmul.f32 0.35355338, %v135_v53  ;;  %v6090_v6 = vadd.f32 %v288_v42, %v183_v51 }
  0xe4   :  { %v144_v45 = vpop.f32.mrb[3].mxu0  ;;  %v150_v56 = vadd.f32 %v5340_v43, %v48_v49 }
  0xe5   :  { %v145_v4 = vadd.f32 %v144_v45, %v48_v49 }
  0xe6   :  { %v6068_v0 = vmul.f32 0.35355338, %v150_v56 }
  0xe7   :  { %v5343_v48 = vpop.f32.mrb[4].mxu0  ;;  %v6094_v7 = vmul.f32 0.35355338, %v145_v4 }
  0xe8   :  { %v154_v50 = vpop.f32.mrb[5].mxu0  ;;  %v160_v1 = vadd.f32 %v5343_v48, %v48_v49 }
  0xe9   :  { %v155_v8 = vadd.f32 %v154_v50, %v48_v49 }
  0xea   :  { %v6086_v5 = vmul.f32 0.35355338, %v160_v1 }
  0xeb   :  { %v5354_v52 = vpop.f32.mrb[6].mxu0  ;;  %v6110_v9 = vmul.f32 0.35355338, %v155_v8 }
  0xec   :  { %v268_v54 = vpop.f32.mrb[7].mxu0  ;;  %v6060_v62 = vadd.f32 %v5354_v52, %v183_v51 }
  0xed   :  { %v6051_v55 = vadd.f32 %v268_v54, %v183_v51 }
  0xef   :  { %v5357_v57 = vpop.f32.mrb[8].mxu0  ;;  %5379 = vmatpush3.xpose.msk.msra.mxu1 %vm425_vm2, %v6051_v55 }
  0xf0   :  { %v6057_v60 = vadd.f32 %v5357_v57, %v183_v51  ;;  %v278_v61 = vpop.f32.mrb[9].mxu0  ;;  %5383 = vmatprep.subr.mxu1 %v5872_v34 }
  0xf1   :  { %v6070_v2 = vadd.f32 %v278_v61, %v183_v51 }
  0xf2   :  { %5381 = vmatmul.mubr.msk.f32.vlgmr.msra.gmra.mrb[2].mxu1 %vm425_vm2, %v6055_v59  ;;  %5394 = vmatpush3.xpose.msk.msra.mxu0 %vm425_vm2, %v6057_v60 }
  0xf3   :  { %5384 = vmatpush3.xpose.msk.msra.mxu1 %vm425_vm2, %v6060_v62  ;;  %5385 = vmatprep.mubr.msk.f32.mxu1 %vm5873_vm1, %v5872_v34  ;;  %v5371_v12 = vpop.f32.mrb[10].mxu0 }
  0xf4   :  { %5403 = vmatprep.subr.mxu0 %v5872_v34  ;;  %5388 = vmatprep.subr.mxu1 %v5872_v34  ;;  %v6118_v13 = vadd.f32 %v5371_v12, %v311_v11  ;;  %v396_v14 = vpop.f32.mrb[11].mxu0 }
  0xf5   :  { %5396 = vmatmul.mubr.msk.f32.vlgmr.msra.gmra.mrb[16].mxu0 %vm425_vm2, %v6068_v0  ;;  %v6120_v15 = vadd.f32 %v396_v14, %v311_v11 }
  0xf6   :  { %5386 = vmatmul.mubr.msk.f32.vlgmr.msra.gmra.mrb[4].mxu1 %vm425_vm2, %v6076_v3  ;;  %5404 = vmatpush3.xpose.msk.msra.mxu0 %vm425_vm2, %v6066_v63 }
  0xf7   :  { %5389 = vmatpush3.xpose.msk.msra.mxu1 %vm425_vm2, %v6070_v2  ;;  %5405 = vmatprep.mubr.msk.f32.mxu0 %vm5873_vm1, %v5872_v34  ;;  %v5374_v16 = vpop.f32.mrb[12].mxu0 }
  0xf8   :  { %5390 = vmatprep.mubr.msk.f32.mxu1 %vm5873_vm1, %v5872_v34  ;;  %5398 = vmatprep.subr.mxu1 %v5872_v34  ;;  %v6125_v17 = vadd.f32 %v5374_v16, %v311_v11  ;;  %v406_v18 = vpop.f32.mrb[13].mxu0 }
  0xf9   :  { %5406 = vmatmul.mubr.msk.f32.vlgmr.msra.gmra.mrb[18].mxu0 %vm425_vm2, %v6086_v5  ;;  %5413 = vmatprep.subr.mxu0 %v5872_v34  ;;  %v6128_v19 = vadd.f32 %v406_v18, %v311_v11 }
  0xfa   :  { %5391 = vmatmul.mubr.msk.f32.vlgmr.msra.gmra.mrb[6].mxu1 %vm425_vm2, %v6094_v7  ;;  %5415 = vmatprep.mubr.msk.f32.mxu0 %vm5873_vm1, %v5872_v34 }
  0xfb   :  { %5399 = vmatpush3.xpose.msk.msra.mxu1 %vm425_vm2, %v6090_v6  ;;  %5400 = vmatprep.mubr.msk.f32.mxu1 %vm5873_vm1, %v5872_v34  ;;  %v5377_v20 = vpop.f32.mrb[14].mxu0 }
  0xfc   :  { %5408 = vmatprep.subr.mxu1 %v5872_v34  ;;  %5414 = vmatpush3.msra.mxu0 %v6118_v13  ;;  %v6130_v21 = vadd.f32 %v5377_v20, %v311_v11  ;;  %v416_v22 = vpop.f32.mrb[15].mxu0 }
  0xfd   :  { %5423 = vmatprep.subr.mxu0 %v5872_v34  ;;  %v6132_v23 = vadd.f32 %v416_v22, %v311_v11 }
  0xfe   :  { %5401 = vmatmul.mubr.msk.f32.vlgmr.msra.gmra.mrb[8].mxu1 %vm425_vm2, %v6110_v9 }
  0xff   :  { %5410 = vmatprep.mubr.msk.f32.mxu1 %vm5873_vm1, %v5872_v34  ;;  %5409 = vmatpush3.msra.mxu1 %v6120_v15 }
 0x100   :  { %5418 = vmatprep.subr.mxu1 %v5872_v34 }
 0x1c5   :  { %v498_v24 = vpop.f32.mrb[2].mxu1 }
 0x1c6   :  { %v5382_v25 = vpop.f32.mrb[3].mxu1  ;;  %v882_v26 = vsel %vm425_vm2, %v498_v24, -inf }
 0x1c7   :  { %883 = vmax.xlane.f32.xlu0 %v882_v26 }
 0x1c8   :  { %v726_v27 = vpop.f32.mrb[16].mxu0 }
 0x1c9   :  { %v574_v28 = vpop.f32.mrb[4].mxu1  ;;  %v5397_v29 = vpop.f32.mrb[17].mxu0  ;;  %v891_v41 = vsel %vm425_vm2, %v726_v27, -inf }
 0x1ca   :  { %v5387_v30 = vpop.f32.mrb[5].mxu1  ;;  %v885_v31 = vsel %vm425_vm2, %v574_v28, -inf }
 0x1cb   :  { %886 = vmax.xlane.f32.xlu0 %v885_v31 }
 0x1cc   :  { %v878_v32 = vpop.f32.mrb[18].mxu0 }
 0x1cd   :  { %v650_v33 = vpop.f32.mrb[6].mxu1  ;;  %v5407_v35 = vpop.f32.mrb[19].mxu0  ;;  %v897_v43 = vsel %vm425_vm2, %v878_v32, -inf }
 0x1ce   :  { %v5392_v36 = vpop.f32.mrb[7].mxu1  ;;  %v888_v37 = vsel %vm425_vm2, %v650_v33, -inf }
 0x1cf   :  { %889 = vmax.xlane.f32.xlu1 %v888_v37 }
 0x1d1   :  { %v802_v38 = vpop.f32.mrb[8].mxu1 }
 0x1d2   :  { %v5402_v40 = vpop.f32.mrb[9].mxu1  ;;  %v894_v42 = vsel %vm425_vm2, %v802_v38, -inf }
 0x1d3   :  { %892 = vmax.xlane.f32.xlu1 %v891_v41  ;;  %895 = vmax.xlane.f32.xlu0 %v894_v42 }
 0x1d7   :  { %898 = vmax.xlane.f32.xlu1 %v897_v43 }
 0x1e8   :  { %1466 = vrot.lane.b32.xlu1 %v6060_v62, %s5874_s26 }
 0x1e9   :  { %1388 = vrot.lane.b32.xlu0 %v6051_v55, %s5874_s26 }
 0x1ec   :  { %1386 = vrot.lane.b32.xlu1 %v6055_v59, %s5874_s26 }
 0x1f0   :  { %1464 = vrot.lane.b32.xlu1 %v6076_v3, %s5874_s26 }
 0x254   :  { %v884_v44 = vpop.xlane.xlu0 %883 }
 0x255   :  { %v900_v45 = vsub.f32 %v498_v24, %v884_v44 }
 0x257   :  { %v906_v46 = vmul.f32 1.442695, %v900_v45 }
 0x258   :  { %v887_v47 = vpop.xlane.xlu0 %886 }
 0x259   :  { %5745 = vpow2.f32 %v906_v46  ;;  %v901_v50 = vsub.f32 %v574_v28, %v887_v47 }
 0x25b   :  { %v908_v58 = vmul.f32 1.442695, %v901_v50 }
 0x25c   :  { %v890_v48 = vpop.xlane.xlu1 %889 }
 0x25d   :  { %v902_v49 = vsub.f32 %v650_v33, %v890_v48 }
 0x25f   :  { %v910_v51 = vmul.f32 1.442695, %v902_v49 }
 0x260   :  { %v893_v52 = vpop.xlane.xlu1 %892  ;;  %v896_v53 = vpop.xlane.xlu0 %895 }
 0x261   :  { %5747 = vpow2.f32 %v910_v51  ;;  %v903_v54 = vsub.f32 %v726_v27, %v893_v52  ;;  %v904_v56 = vsub.f32 %v802_v38, %v896_v53 }
 0x263   :  { %v5746_v57 = vpop.eup %5745  ;;  %v912_v61 = vmul.f32 1.442695, %v903_v54  ;;  %v914_v1 = vmul.f32 1.442695, %v904_v56 }
 0x264   :  { %v899_v4 = vpop.xlane.xlu1 %898  ;;  %v918_v8 = vsel %vm425_vm2, %v5746_v57, 0.0  ;;  %v1389_v28 = vpop.permute.xlu0 %1388 }
 0x265   :  { %5749 = vpow2.f32 %v912_v61  ;;  %v905_v10 = vsub.f32 %v878_v32, %v899_v4  ;;  %919 = vadd.xlane.f32.xlu0 %v918_v8 }
 0x266   :  { %5751 = vpow2.f32 %v914_v1 }
 0x267   :  { %5753 = vpow2.f32 %v908_v58  ;;  %v916_v11 = vmul.f32 1.442695, %v905_v10 }
 0x268   :  { %v6176_v29 = vpop.permute.xlu1 %1466 }
 0x269   :  { %5755 = vpow2.f32 %v916_v11 }
 0x26b   :  { %v5748_v12 = vpop.eup %5747 }
 0x26c   :  { %v924_v14 = vsel %vm425_vm2, %v5748_v12, 0.0  ;;  %v1387_v31 = vpop.permute.xlu1 %1386 }
 0x26d   :  { %925 = vadd.xlane.f32.xlu0 %v924_v14 }
 0x26f   :  { %v6150_v16 = vpop.eup %5749 }
 0x270   :  { %v5752_v18 = vpop.eup %5751  ;;  %v927_v20 = vsel %vm425_vm2, %v6150_v16, 0.0  ;;  %v6178_v32 = vpop.permute.xlu1 %1464 }
 0x271   :  { %v5754_v22 = vpop.eup %5753  ;;  %928 = vadd.xlane.f32.xlu1 %v927_v20  ;;  %v930_v24 = vsel %vm425_vm2, %v5752_v18, 0.0 }
 0x272   :  { %931 = vadd.xlane.f32.xlu0 %v930_v24  ;;  %v921_v25 = vsel %vm425_vm2, %v5754_v22, 0.0 }
 0x273   :  { %v6156_v26 = vpop.eup %5755 }
 0x274   :  { %v933_v27 = vsel %vm425_vm2, %v6156_v26, 0.0 }
 0x275   :  { %922 = vadd.xlane.f32.xlu1 %v921_v25 }
 0x279   :  { %934 = vadd.xlane.f32.xlu1 %v933_v27 }
 0x288   :  { %1544 = vrot.lane.b32.xlu0 %v6070_v2, %s5874_s26 }
 0x28a   :  { %1622 = vrot.lane.b32.xlu1 %v6057_v60, %s5874_s26 }
 0x28c   :  { %1542 = vrot.lane.b32.xlu0 %v6094_v7, %s5874_s26 }
 0x28e   :  { %1620 = vrot.lane.b32.xlu1 %v6068_v0, %s5874_s26 }
 0x290   :  { %1700 = vrot.lane.b32.xlu0 %v6090_v6, %s5874_s26 }
 0x292   :  { %1778 = vrot.lane.b32.xlu1 %v6066_v63, %s5874_s26 }
 0x294   :  { %1698 = vrot.lane.b32.xlu0 %v6110_v9, %s5874_s26 }
 0x296   :  { %1776 = vrot.lane.b32.xlu1 %v6086_v5, %s5874_s26 }
 0x2f2   :  { %v920_v30 = vpop.xlane.xlu0 %919 }
 0x2f3   :  { %5757 = vrcp.f32 %v920_v30 }
 0x2fa   :  { %v926_v33 = vpop.xlane.xlu0 %925 }
 0x2fb   :  { %5759 = vrcp.f32 %v926_v33 }
 0x2fd   :  { %v5758_v35 = vpop.eup %5757 }
 0x2fe   :  { %v929_v36 = vpop.xlane.xlu1 %928  ;;  %v937_v37 = vmul.f32 %v5758_v35, %v5746_v57 }
 0x2ff   :  { %v932_v38 = vpop.xlane.xlu0 %931 }
 0x300   :  { %5761 = vrcp.f32 %v932_v38  ;;  %5411 = vmatmul.mubr.msk.f32.vlgmr.msra.gmra.mrb[10].mxu1 %vm425_vm2, %v937_v37 }
 0x301   :  { %5419 = vmatpush3.msra.mxu1 %v6128_v19  ;;  %5420 = vmatprep.mubr.msk.f32.mxu1 %vm5873_vm1, %v5872_v34 }
 0x302   :  { %v923_v40 = vpop.xlane.xlu1 %922  ;;  %5428 = vmatprep.subr.mxu1 %v5872_v34 }
 0x303   :  { %5763 = vrcp.f32 %v923_v40  ;;  %v1545_v44 = vpop.permute.xlu0 %1544 }
 0x304   :  { %5765 = vrcp.f32 %v929_v36 }
 0x305   :  { %v5760_v41 = vpop.eup %5759 }
 0x306   :  { %v935_v42 = vpop.xlane.xlu1 %934  ;;  %v941_v43 = vmul.f32 %v5760_v41, %v5748_v12 }
 0x307   :  { %5767 = vrcp.f32 %v935_v42  ;;  %v1543_v48 = vpop.permute.xlu0 %1542 }
 0x308   :  { %5421 = vmatmul.mubr.msk.f32.vlgmr.msra.gmra.mrb[12].mxu1 %vm425_vm2, %v941_v43 }
 0x309   :  { %5429 = vmatpush3.msra.mxu1 %v6132_v23  ;;  %5430 = vmatprep.mubr.msk.f32.mxu1 %vm5873_vm1, %v5872_v34 }
 0x30a   :  { %v5762_v45 = vpop.eup %5761  ;;  %5438 = vmatprep.subr.mxu1 %v5872_v34  ;;  %v1623_v53 = vpop.permute.xlu1 %1622 }
 0x30b   :  { %v945_v46 = vmul.f32 %v5762_v45, %v5752_v18  ;;  %v1701_v54 = vpop.permute.xlu0 %1700 }
 0x30d   :  { %v5764_v47 = vpop.eup %5763  ;;  %5431 = vmatmul.mubr.msk.f32.vlgmr.msra.gmra.mrb[14].mxu1 %vm425_vm2, %v945_v46 }
 0x30e   :  { %v939_v49 = vmul.f32 %v5764_v47, %v5754_v22  ;;  %5440 = vmatprep.mubr.msk.f32.mxu1 %vm5873_vm1, %v5872_v34  ;;  %v5766_v50 = vpop.eup %5765  ;;  %v1621_v57 = vpop.permute.xlu1 %1620 }
 0x30f   :  { %v943_v51 = vmul.f32 %v5766_v50, %v6150_v16  ;;  %v1699_v58 = vpop.permute.xlu0 %1698 }
 0x310   :  { %5439 = vmatpush3.xpose.msk.msra.mxu1 %vm425_vm2, %v1389_v28  ;;  %5416 = vmatmul.mubr.msk.f32.vlgmr.msra.gmra.mrb[20].mxu0 %vm425_vm2, %v939_v49 }
 0x311   :  { %5424 = vmatpush3.msra.mxu0 %v6125_v17  ;;  %5448 = vmatprep.subr.mxu1 %v5872_v34  ;;  %v5768_v52 = vpop.eup %5767 }
 0x312   :  { %5425 = vmatprep.mubr.msk.f32.mxu0 %vm5873_vm1, %v5872_v34  ;;  %5433 = vmatprep.subr.mxu0 %v5872_v34  ;;  %v947_v56 = vmul.f32 %v5768_v52, %v6156_v26  ;;  %v1779_v61 = vpop.permute.xlu1 %1778 }
 0x313   :  { %5441 = vmatmul.mubr.msk.f32.vlgmr.msra.gmra.mrb[16].mxu1 %vm425_vm2, %v1387_v31 }
 0x314   :  { %5449 = vmatpush3.xpose.msk.msra.mxu1 %vm425_vm2, %v1545_v44  ;;  %5426 = vmatmul.mubr.msk.f32.vlgmr.msra.gmra.mrb[22].mxu0 %vm425_vm2, %v943_v51 }
 0x315   :  { %5434 = vmatpush3.msra.mxu0 %v6130_v21  ;;  %5450 = vmatprep.mubr.msk.f32.mxu1 %vm5873_vm1, %v5872_v34 }
 0x316   :  { %5458 = vmatprep.subr.mxu1 %v5872_v34  ;;  %5435 = vmatprep.mubr.msk.f32.mxu0 %vm5873_vm1, %v5872_v34  ;;  %v1777_v1 = vpop.permute.xlu1 %1776 }
 0x317   :  { %5451 = vmatmul.mubr.msk.f32.vlgmr.msra.gmra.mrb[18].mxu1 %vm425_vm2, %v1543_v48  ;;  %5443 = vmatprep.subr.mxu0 %v5872_v34 }
 0x318   :  { %5459 = vmatpush3.xpose.msk.msra.mxu1 %vm425_vm2, %v1701_v54  ;;  %5436 = vmatmul.mubr.msk.f32.vlgmr.msra.gmra.mrb[24].mxu0 %vm425_vm2, %v947_v56 }
 0x319   :  { %5460 = vmatprep.mubr.msk.f32.mxu1 %vm5873_vm1, %v5872_v34  ;;  %5445 = vmatprep.mubr.msk.f32.mxu0 %vm5873_vm1, %v5872_v34 }
 0x31a   :  { %5468 = vmatprep.subr.mxu1 %v5872_v34 }
 0x31b   :  { %5461 = vmatmul.mubr.msk.f32.vlgmr.msra.gmra.mrb[20].mxu1 %vm425_vm2, %v1699_v58 }
 0x31c   :  { %5444 = vmatpush3.xpose.msk.msra.mxu0 %vm425_vm2, %v6176_v29  ;;  %5470 = vmatprep.mubr.msk.f32.mxu1 %vm5873_vm1, %v5872_v34 }
 0x31d   :  { %5453 = vmatprep.subr.mxu0 %v5872_v34 }
 0x31f   :  { %5446 = vmatmul.mubr.msk.f32.vlgmr.msra.gmra.mrb[26].mxu0 %vm425_vm2, %v6178_v32 }
 0x320   :  { %5454 = vmatpush3.xpose.msk.msra.mxu0 %vm425_vm2, %v1623_v53  ;;  %5455 = vmatprep.mubr.msk.f32.mxu0 %vm5873_vm1, %v5872_v34 }
 0x321   :  { %5463 = vmatprep.subr.mxu0 %v5872_v34 }
 0x323   :  { %5456 = vmatmul.mubr.msk.f32.vlgmr.msra.gmra.mrb[28].mxu0 %vm425_vm2, %v1621_v57 }
 0x324   :  { %5464 = vmatpush3.xpose.msk.msra.mxu0 %vm425_vm2, %v1779_v61  ;;  %5465 = vmatprep.mubr.msk.f32.mxu0 %vm5873_vm1, %v5872_v34 }
 0x325   :  { %5473 = vmatprep.subr.mxu0 %v5872_v34 }
 0x327   :  { %5466 = vmatmul.mubr.msk.f32.vlgmr.msra.gmra.mrb[30].mxu0 %vm425_vm2, %v1777_v1 }
 0x328   :  { %5475 = vmatprep.mubr.msk.f32.mxu0 %vm5873_vm1, %v5872_v34 }
 0x3d3   :  { %v6240_v4 = vpop.f32.mrb[10].mxu1 }
 0x3d4   :  { %v5412_v8 = vpop.f32.mrb[11].mxu1 }
 0x3db   :  { %v6242_v10 = vpop.f32.mrb[12].mxu1 }
 0x3dc   :  { %v5422_v11 = vpop.f32.mrb[13].mxu1 }
 0x3e0   :  { %v6244_v12 = vpop.f32.mrb[14].mxu1 }
 0x3e1   :  { %v5432_v14 = vpop.f32.mrb[15].mxu1 }
 0x3e3   :  { %v6246_v16 = vpop.f32.mrb[20].mxu0 }
 0x3e4   :  { %v5417_v18 = vpop.f32.mrb[21].mxu0 }
 0x3e6   :  { %v1460_v20 = vpop.f32.mrb[16].mxu1 }
 0x3e7   :  { %v5442_v22 = vpop.f32.mrb[17].mxu1  ;;  %v6248_v24 = vpop.f32.mrb[22].mxu0  ;;  %v1854_v25 = vsel %vm425_vm2, %v1460_v20, -inf }
 0x3e8   :  { %1855 = vmax.xlane.f32.xlu0 %v1854_v25  ;;  %v5427_v26 = vpop.f32.mrb[23].mxu0 }
 0x3ea   :  { %v1616_v27 = vpop.f32.mrb[18].mxu1 }
 0x3eb   :  { %v5452_v28 = vpop.f32.mrb[19].mxu1  ;;  %v6251_v29 = vpop.f32.mrb[24].mxu0  ;;  %v1860_v30 = vsel %vm425_vm2, %v1616_v27, -inf }
 0x3ec   :  { %1861 = vmax.xlane.f32.xlu0 %v1860_v30  ;;  %v5437_v31 = vpop.f32.mrb[25].mxu0 }
 0x3ee   :  { %v1772_v32 = vpop.f32.mrb[20].mxu1 }
 0x3ef   :  { %v5462_v33 = vpop.f32.mrb[21].mxu1  ;;  %v1866_v44 = vsel %vm425_vm2, %v1772_v32, -inf }
 0x3f2   :  { %v1538_v35 = vpop.f32.mrb[26].mxu0 }
 0x3f3   :  { %v5447_v36 = vpop.f32.mrb[27].mxu0  ;;  %v1857_v37 = vsel %vm425_vm2, %v1538_v35, -inf }
 0x3f4   :  { %1858 = vmax.xlane.f32.xlu1 %v1857_v37 }
 0x3f6   :  { %v1694_v38 = vpop.f32.mrb[28].mxu0 }
 0x3f7   :  { %v5457_v40 = vpop.f32.mrb[29].mxu0  ;;  %v1863_v41 = vsel %vm425_vm2, %v1694_v38, -inf }
 0x3f8   :  { %1864 = vmax.xlane.f32.xlu0 %v1863_v41 }
 0x3fa   :  { %v6256_v42 = vpop.f32.mrb[30].mxu0 }
 0x3fb   :  { %v5467_v43 = vpop.f32.mrb[31].mxu0  ;;  %v1869_v45 = vsel %vm425_vm2, %v6256_v42, -inf }
 0x3fc   :  { %1867 = vmax.xlane.f32.xlu0 %v1866_v44 }
 0x405   :  { %1998 = vrot.lane.b32.xlu1 %v6118_v13, %s5874_s26 }
 0x409   :  { %2075 = vrot.lane.b32.xlu1 %v6128_v19, %s5874_s26 }
 0x40d   :  { %2152 = vrot.lane.b32.xlu1 %v6125_v17, %s5874_s26 }
 0x411   :  { %2306 = vrot.lane.b32.xlu1 %v6130_v21, %s5874_s26 }
 0x412   :  { %1921 = vrot.lane.b32.xlu0 %v6120_v15, %s5874_s26 }
 0x415   :  { %2462 = vrot.lane.b32.xlu1 %v6060_v62, %s5875_s27 }
 0x416   :  { %2229 = vrot.lane.b32.xlu0 %v6132_v23, %s5874_s26 }
 0x41a   :  { %2384 = vrot.lane.b32.xlu0 %v6051_v55, %s5875_s27 }
 0x41e   :  { %2382 = vrot.lane.b32.xlu0 %v6055_v59, %s5875_s27 }
 0x439   :  { %1870 = vmax.xlane.f32.xlu1 %v1869_v45 }
 0x44a   :  { %2460 = vrot.lane.b32.xlu1 %v6076_v3, %s5875_s27 }
 0x475   :  { %v1856_v46 = vpop.xlane.xlu0 %1855 }
 0x476   :  { %v1872_v47 = vsub.f32 %v1460_v20, %v1856_v46 }
 0x478   :  { %v1878_v48 = vmul.f32 1.442695, %v1872_v47 }
 0x479   :  { %v1862_v49 = vpop.xlane.xlu0 %1861 }
 0x47a   :  { %5769 = vpow2.f32 %v1878_v48  ;;  %v1874_v50 = vsub.f32 %v1616_v27, %v1862_v49 }
 0x47c   :  { %v1882_v51 = vmul.f32 1.442695, %v1874_v50 }
 0x47e   :  { %5771 = vpow2.f32 %v1882_v51 }
 0x481   :  { %v1859_v52 = vpop.xlane.xlu1 %1858 }
 0x482   :  { %v1873_v53 = vsub.f32 %v1538_v35, %v1859_v52 }
 0x484   :  { %v6281_v54 = vpop.eup %5769  ;;  %v1880_v56 = vmul.f32 1.442695, %v1873_v53 }
 0x485   :  { %v1999_v57 = vpop.permute.xlu1 %1998  ;;  %v1865_v58 = vpop.xlane.xlu0 %1864  ;;  %v1890_v61 = vsel %vm425_vm2, %v6281_v54, 0.0 }
 0x486   :  { %5773 = vpow2.f32 %v1880_v56  ;;  %v1875_v1 = vsub.f32 %v1694_v38, %v1865_v58  ;;  %5474 = vmatpush3.msra.mxu0 %v1999_v57  ;;  %1891 = vadd.xlane.f32.xlu0 %v1890_v61 }
 0x487   :  { %5483 = vmatprep.subr.mxu0 %v5872_v34 }
 0x488   :  { %v6286_v8 = vpop.eup %5771  ;;  %v1884_v11 = vmul.f32 1.442695, %v1875_v1 }
 0x489   :  { %v1868_v14 = vpop.xlane.xlu0 %1867  ;;  %v1896_v18 = vsel %vm425_vm2, %v6286_v8, 0.0  ;;  %v2076_v33 = vpop.permute.xlu1 %2075 }
 0x48a   :  { %5775 = vpow2.f32 %v1884_v11  ;;  %v1876_v20 = vsub.f32 %v1772_v32, %v1868_v14  ;;  %1897 = vadd.xlane.f32.xlu0 %v1896_v18 }
 0x48c   :  { %v1886_v22 = vmul.f32 1.442695, %v1876_v20 }
 0x48d   :  { %v1922_v25 = vpop.permute.xlu0 %1921  ;;  %v2153_v35 = vpop.permute.xlu1 %2152 }
 0x48e   :  { %5777 = vpow2.f32 %v1886_v22  ;;  %5469 = vmatpush3.msra.mxu1 %v1922_v25 }
 0x48f   :  { %5478 = vmatprep.subr.mxu1 %v5872_v34 }
 0x490   :  { %v6291_v26 = vpop.eup %5773 }
 0x491   :  { %v1893_v27 = vsel %vm425_vm2, %v6291_v26, 0.0  ;;  %v2307_v36 = vpop.permute.xlu1 %2306 }
 0x492   :  { %1894 = vadd.xlane.f32.xlu1 %v1893_v27 }
 0x494   :  { %v6295_v28 = vpop.eup %5775 }
 0x495   :  { %v1899_v30 = vsel %vm425_vm2, %v6295_v28, 0.0  ;;  %v6315_v37 = vpop.permute.xlu1 %2462 }
 0x496   :  { %1900 = vadd.xlane.f32.xlu1 %v1899_v30 }
 0x498   :  { %v6299_v31 = vpop.eup %5777 }
 0x499   :  { %v1902_v32 = vsel %vm425_vm2, %v6299_v31, 0.0 }
 0x49a   :  { %1903 = vadd.xlane.f32.xlu0 %v1902_v32 }
 0x4a7   :  { %2618 = vrot.lane.b32.xlu1 %v6057_v60, %s5875_s27 }
 0x4b0   :  { %2540 = vrot.lane.b32.xlu0 %v6070_v2, %s5875_s27 }
 0x4b4   :  { %2538 = vrot.lane.b32.xlu0 %v6094_v7, %s5875_s27 }
 0x4b8   :  { %2696 = vrot.lane.b32.xlu0 %v6090_v6, %s5875_s27 }
 0x4bc   :  { %2694 = vrot.lane.b32.xlu0 %v6110_v9, %s5875_s27 }
 0x4c0   :  { %2916 = vrot.lane.b32.xlu0 %v6120_v15, %s5875_s27 }
 0x4c4   :  { %3220 = vrot.lane.b32.xlu0 %v6132_v23, %s5875_s27 }
 0x4c6   :  { %v1871_v38 = vpop.xlane.xlu1 %1870 }
 0x4c7   :  { %v1877_v40 = vsub.f32 %v6256_v42, %v1871_v38 }
 0x4c8   :  { %3374 = vrot.lane.b32.xlu0 %v6051_v55, %s5876_s28  ;;  %v2230_v55 = vpop.permute.xlu0 %2229 }
 0x4c9   :  { %v1888_v41 = vmul.f32 1.442695, %v1877_v40 }
 0x4ca   :  { %v6342_v48 = vpop.permute.xlu1 %2460 }
 0x4cb   :  { %5779 = vpow2.f32 %v1888_v41 }
 0x4cc   :  { %v2385_v42 = vpop.permute.xlu0 %2384 }
 0x4d0   :  { %v2383_v45 = vpop.permute.xlu0 %2382 }
 0x4d5   :  { %v6322_v43 = vpop.eup %5779 }
 0x4d6   :  { %v1905_v44 = vsel %vm425_vm2, %v6322_v43, 0.0 }
 0x4d7   :  { %1906 = vadd.xlane.f32.xlu1 %v1905_v44 }
 0x4e8   :  { %2616 = vrot.lane.b32.xlu1 %v6068_v0, %s5875_s27 }
 0x4ec   :  { %2774 = vrot.lane.b32.xlu1 %v6066_v63, %s5875_s27 }
 0x4f0   :  { %2772 = vrot.lane.b32.xlu1 %v6086_v5, %s5875_s27 }
 0x4f4   :  { %2992 = vrot.lane.b32.xlu1 %v6118_v13, %s5875_s27 }
 0x4f8   :  { %3068 = vrot.lane.b32.xlu1 %v6128_v19, %s5875_s27 }
 0x4fc   :  { %3144 = vrot.lane.b32.xlu1 %v6125_v17, %s5875_s27 }
 0x500   :  { %3296 = vrot.lane.b32.xlu1 %v6130_v21, %s5875_s27 }
 0x504   :  { %3452 = vrot.lane.b32.xlu1 %v6060_v62, %s5876_s28 }
 0x513   :  { %v1892_v46 = vpop.xlane.xlu0 %1891 }
 0x514   :  { %5781 = vrcp.f32 %v1892_v46 }
 0x517   :  { %v1898_v47 = vpop.xlane.xlu0 %1897 }
 0x518   :  { %5783 = vrcp.f32 %v1898_v47 }
 0x51e   :  { %v5782_v49 = vpop.eup %5781 }
 0x51f   :  { %v1895_v50 = vpop.xlane.xlu1 %1894  ;;  %v1909_v51 = vmul.f32 %v5782_v49, %v6281_v54 }
 0x520   :  { %5785 = vrcp.f32 %v1895_v50 }
 0x521   :  { %5471 = vmatmul.mubr.msk.f32.vlgmr.msra.gmra.mrb[22].mxu1 %vm425_vm2, %v1909_v51 }
 0x522   :  { %v5784_v52 = vpop.eup %5783  ;;  %5479 = vmatpush3.msra.mxu1 %v2076_v33  ;;  %5480 = vmatprep.mubr.msk.f32.mxu1 %vm5873_vm1, %v5872_v34 }
 0x523   :  { %v1901_v62 = vpop.xlane.xlu1 %1900  ;;  %5488 = vmatprep.subr.mxu1 %v5872_v34  ;;  %v1913_v53 = vmul.f32 %v5784_v52, %v6286_v8 }
 0x524   :  { %5787 = vrcp.f32 %v1901_v62 }
 0x525   :  { %5481 = vmatmul.mubr.msk.f32.vlgmr.msra.gmra.mrb[24].mxu1 %vm425_vm2, %v1913_v53 }
 0x526   :  { %5489 = vmatpush3.msra.mxu1 %v2230_v55  ;;  %5490 = vmatprep.mubr.msk.f32.mxu1 %vm5873_vm1, %v5872_v34 }
 0x527   :  { %v1904_v54 = vpop.xlane.xlu0 %1903  ;;  %5498 = vmatprep.subr.mxu1 %v5872_v34  ;;  %v2619_v25 = vpop.permute.xlu1 %2618 }
 0x528   :  { %5789 = vrcp.f32 %v1904_v54 }
 0x52a   :  { %v5786_v56 = vpop.eup %5785 }
 0x52b   :  { %v2541_v57 = vpop.permute.xlu0 %2540  ;;  %v1911_v58 = vmul.f32 %v5786_v56, %v6291_v26 }
 0x52d   :  { %5476 = vmatmul.mubr.msk.f32.vlgmr.msra.gmra.mrb[32].mxu0 %vm425_vm2, %v1911_v58 }
 0x52e   :  { %v5788_v61 = vpop.eup %5787  ;;  %5484 = vmatpush3.msra.mxu0 %v2153_v35  ;;  %5485 = vmatprep.mubr.msk.f32.mxu0 %vm5873_vm1, %v5872_v34 }
 0x52f   :  { %v2539_v1 = vpop.permute.xlu0 %2538  ;;  %5493 = vmatprep.subr.mxu0 %v5872_v34  ;;  %v1915_v8 = vmul.f32 %v5788_v61, %v6295_v28 }
 0x531   :  { %5486 = vmatmul.mubr.msk.f32.vlgmr.msra.gmra.mrb[34].mxu0 %vm425_vm2, %v1915_v8 }
 0x532   :  { %v5790_v11 = vpop.eup %5789  ;;  %5494 = vmatpush3.msra.mxu0 %v2307_v36  ;;  %5495 = vmatprep.mubr.msk.f32.mxu0 %vm5873_vm1, %v5872_v34 }
 0x533   :  { %v1917_v14 = vmul.f32 %v5790_v11, %v6299_v31  ;;  %5503 = vmatprep.subr.mxu0 %v5872_v34  ;;  %v2697_v18 = vpop.permute.xlu0 %2696 }
 0x535   :  { %5491 = vmatmul.mubr.msk.f32.vlgmr.msra.gmra.mrb[26].mxu1 %vm425_vm2, %v1917_v14 }
 0x536   :  { %5499 = vmatpush3.xpose.msk.msra.mxu1 %vm425_vm2, %v2385_v42  ;;  %5500 = vmatprep.mubr.msk.f32.mxu1 %vm5873_vm1, %v5872_v34 }
 0x537   :  { %5508 = vmatprep.subr.mxu1 %v5872_v34  ;;  %v2695_v20 = vpop.permute.xlu0 %2694 }
 0x539   :  { %5501 = vmatmul.mubr.msk.f32.vlgmr.msra.gmra.mrb[28].mxu1 %vm425_vm2, %v2383_v45 }
 0x53a   :  { %5509 = vmatpush3.xpose.msk.msra.mxu1 %vm425_vm2, %v2541_v57  ;;  %5510 = vmatprep.mubr.msk.f32.mxu1 %vm5873_vm1, %v5872_v34 }
 0x53b   :  { %5518 = vmatprep.subr.mxu1 %v5872_v34  ;;  %v2917_v22 = vpop.permute.xlu0 %2916 }
 0x53d   :  { %5511 = vmatmul.mubr.msk.f32.vlgmr.msra.gmra.mrb[30].mxu1 %vm425_vm2, %v2539_v1 }
 0x53e   :  { %5519 = vmatpush3.xpose.msk.msra.mxu1 %vm425_vm2, %v2697_v18  ;;  %5520 = vmatprep.mubr.msk.f32.mxu1 %vm5873_vm1, %v5872_v34 }
 0x53f   :  { %5528 = vmatprep.subr.mxu1 %v5872_v34 }
 0x541   :  { %5521 = vmatmul.mubr.msk.f32.vlgmr.msra.gmra.mrb[32].mxu1 %vm425_vm2, %v2695_v20  ;;  %v6431_v20 = vpop.permute.xlu0 %3220 }
 0x542   :  { %5529 = vmatpush3.msra.mxu1 %v2917_v22  ;;  %5530 = vmatprep.mubr.msk.f32.mxu1 %vm5873_vm1, %v5872_v34 }
 0x543   :  { %5538 = vmatprep.subr.mxu1 %v5872_v34 }
 0x545   :  { %v6433_v22 = vpop.permute.xlu0 %3374 }
 0x564   :  { %v1907_v26 = vpop.xlane.xlu1 %1906 }
 0x565   :  { %5791 = vrcp.f32 %v1907_v26 }
 0x568   :  { %v2617_v27 = vpop.permute.xlu1 %2616 }
 0x56c   :  { %v2775_v31 = vpop.permute.xlu1 %2774 }
 0x56f   :  { %v5792_v28 = vpop.eup %5791 }
 0x570   :  { %v1919_v30 = vmul.f32 %v5792_v28, %v6322_v43  ;;  %v2773_v32 = vpop.permute.xlu1 %2772 }
 0x572   :  { %5496 = vmatmul.mubr.msk.f32.vlgmr.msra.gmra.mrb[36].mxu0 %vm425_vm2, %v1919_v30 }
 0x573   :  { %5504 = vmatpush3.xpose.msk.msra.mxu0 %vm425_vm2, %v6315_v37  ;;  %5505 = vmatprep.mubr.msk.f32.mxu0 %vm5873_vm1, %v5872_v34 }
 0x574   :  { %5513 = vmatprep.subr.mxu0 %v5872_v34  ;;  %v2993_v33 = vpop.permute.xlu1 %2992 }
 0x576   :  { %5506 = vmatmul.mubr.msk.f32.vlgmr.msra.gmra.mrb[38].mxu0 %vm425_vm2, %v6342_v48 }
 0x577   :  { %5514 = vmatpush3.xpose.msk.msra.mxu0 %vm425_vm2, %v2619_v25  ;;  %5515 = vmatprep.mubr.msk.f32.mxu0 %vm5873_vm1, %v5872_v34 }
 0x578   :  { %5523 = vmatprep.subr.mxu0 %v5872_v34 }
 0x57a   :  { %5516 = vmatmul.mubr.msk.f32.vlgmr.msra.gmra.mrb[40].mxu0 %vm425_vm2, %v2617_v27 }
 0x57b   :  { %5524 = vmatpush3.xpose.msk.msra.mxu0 %vm425_vm2, %v2775_v31  ;;  %5525 = vmatprep.mubr.msk.f32.mxu0 %vm5873_vm1, %v5872_v34 }
 0x57c   :  { %5533 = vmatprep.subr.mxu0 %v5872_v34 }
 0x57e   :  { %5526 = vmatmul.mubr.msk.f32.vlgmr.msra.gmra.mrb[42].mxu0 %vm425_vm2, %v2773_v32 }
 0x57f   :  { %5534 = vmatpush3.msra.mxu0 %v2993_v33  ;;  %5535 = vmatprep.mubr.msk.f32.mxu0 %vm5873_vm1, %v5872_v34 }
 0x580   :  { %5543 = vmatprep.subr.mxu0 %v5872_v34 }
 0x5f4   :  { %v6406_v35 = vpop.f32.mrb[22].mxu1 }
 0x5f5   :  { %v5472_v36 = vpop.f32.mrb[23].mxu1 }
 0x5f6   :  { %v3069_v36 = vpop.permute.xlu1 %3068 }
 0x5f8   :  { %v6408_v37 = vpop.f32.mrb[24].mxu1 }
 0x5f9   :  { %v5482_v38 = vpop.f32.mrb[25].mxu1 }
 0x5fa   :  { %v6439_v38 = vpop.permute.xlu1 %3144 }
 0x600   :  { %v6410_v40 = vpop.f32.mrb[32].mxu0 }
 0x601   :  { %v5477_v41 = vpop.f32.mrb[33].mxu0 }
 0x602   :  { %v6441_v41 = vpop.permute.xlu1 %3296 }
 0x604   :  { %v6412_v43 = vpop.f32.mrb[34].mxu0 }
 0x605   :  { %v5487_v44 = vpop.f32.mrb[35].mxu0 }
 0x606   :  { %v6443_v44 = vpop.permute.xlu1 %3452 }
 0x608   :  { %v6414_v55 = vpop.f32.mrb[26].mxu1 }
 0x609   :  { %v5492_v42 = vpop.f32.mrb[27].mxu1 }
 0x60c   :  { %v2456_v45 = vpop.f32.mrb[28].mxu1 }
 0x60d   :  { %v5502_v46 = vpop.f32.mrb[29].mxu1  ;;  %v2850_v47 = vsel %vm425_vm2, %v2456_v45, -inf }
 0x60e   :  { %2851 = vmax.xlane.f32.xlu0 %v2850_v47 }
 0x610   :  { %v2612_v48 = vpop.f32.mrb[30].mxu1 }
 0x611   :  { %v5512_v49 = vpop.f32.mrb[31].mxu1  ;;  %v2856_v50 = vsel %vm425_vm2, %v2612_v48, -inf }
 0x612   :  { %2857 = vmax.xlane.f32.xlu0 %v2856_v50 }
 0x614   :  { %v2768_v51 = vpop.f32.mrb[32].mxu1 }
 0x615   :  { %v5522_v52 = vpop.f32.mrb[33].mxu1  ;;  %v2862_v14 = vsel %vm425_vm2, %v2768_v51, -inf }
 0x645   :  { %v6418_v62 = vpop.f32.mrb[36].mxu0 }
 0x646   :  { %v5497_v53 = vpop.f32.mrb[37].mxu0 }
 0x649   :  { %v2534_v54 = vpop.f32.mrb[38].mxu0 }
 0x64a   :  { %v5507_v56 = vpop.f32.mrb[39].mxu0  ;;  %v2853_v57 = vsel %vm425_vm2, %v2534_v54, -inf }
 0x64b   :  { %2854 = vmax.xlane.f32.xlu1 %v2853_v57 }
 0x64d   :  { %v2690_v58 = vpop.f32.mrb[40].mxu0 }
 0x64e   :  { %v5517_v61 = vpop.f32.mrb[41].mxu0  ;;  %v2859_v1 = vsel %vm425_vm2, %v2690_v58, -inf }
 0x64f   :  { %2860 = vmax.xlane.f32.xlu0 %v2859_v1 }
 0x651   :  { %v6422_v8 = vpop.f32.mrb[42].mxu0 }
 0x652   :  { %v5527_v11 = vpop.f32.mrb[43].mxu0  ;;  %v2865_v18 = vsel %vm425_vm2, %v6422_v8, -inf }
 0x653   :  { %2863 = vmax.xlane.f32.xlu0 %v2862_v14 }
 0x65c   :  { %3450 = vrot.lane.b32.xlu1 %v6076_v3, %s5876_s28 }
 0x669   :  { %3372 = vrot.lane.b32.xlu0 %v6055_v59, %s5876_s28 }
 0x680   :  { %2866 = vmax.xlane.f32.xlu1 %v2865_v18 }
 0x69b   :  { %v2852_v25 = vpop.xlane.xlu0 %2851 }
 0x69c   :  { %v2868_v26 = vsub.f32 %v2456_v45, %v2852_v25 }
 0x69e   :  { %v2874_v27 = vmul.f32 1.442695, %v2868_v26 }
 0x69f   :  { %v2858_v28 = vpop.xlane.xlu0 %2857 }
 0x6a0   :  { %5793 = vpow2.f32 %v2874_v27  ;;  %v2870_v30 = vsub.f32 %v2612_v48, %v2858_v28 }
 0x6a2   :  { %v2878_v31 = vmul.f32 1.442695, %v2870_v30 }
 0x6a4   :  { %5795 = vpow2.f32 %v2878_v31 }
 0x6aa   :  { %v5794_v3 = vpop.eup %5793 }
 0x6ab   :  { %v2886_v32 = vsel %vm425_vm2, %v5794_v3, 0.0 }
 0x6ac   :  { %2887 = vadd.xlane.f32.xlu0 %v2886_v32 }
 0x6ae   :  { %v5796_v59 = vpop.eup %5795 }
 0x6af   :  { %v2892_v33 = vsel %vm425_vm2, %v5796_v59, 0.0 }
 0x6b0   :  { %2893 = vadd.xlane.f32.xlu0 %v2892_v33 }
 0x6c6   :  { %3530 = vrot.lane.b32.xlu0 %v6070_v2, %s5876_s28 }
 0x6d8   :  { %v2855_v42 = vpop.xlane.xlu1 %2854 }
 0x6d9   :  { %v2869_v45 = vsub.f32 %v2534_v54, %v2855_v42 }
 0x6db   :  { %v2876_v46 = vmul.f32 1.442695, %v2869_v45 }
 0x6dc   :  { %v2861_v47 = vpop.xlane.xlu0 %2860 }
 0x6dd   :  { %5797 = vpow2.f32 %v2876_v46  ;;  %v2871_v54 = vsub.f32 %v2690_v58, %v2861_v47 }
 0x6e0   :  { %v2864_v48 = vpop.xlane.xlu0 %2863 }
 0x6e1   :  { %v2872_v49 = vsub.f32 %v2768_v51, %v2864_v48  ;;  %v2880_v51 = vmul.f32 1.442695, %v2871_v54 }
 0x6e3   :  { %v2882_v50 = vmul.f32 1.442695, %v2872_v49 }
 0x6e5   :  { %5799 = vpow2.f32 %v2882_v50 }
 0x6e6   :  { %5801 = vpow2.f32 %v2880_v51 }
 0x6e7   :  { %v5798_v52 = vpop.eup %5797 }
 0x6e8   :  { %v2889_v53 = vsel %vm425_vm2, %v5798_v52, 0.0 }
 0x6e9   :  { %2890 = vadd.xlane.f32.xlu1 %v2889_v53 }
 0x6ef   :  { %v5800_v2 = vpop.eup %5799 }
 0x6f0   :  { %v2898_v56 = vsel %vm425_vm2, %v5800_v2, 0.0  ;;  %v6455_v57 = vpop.eup %5801 }
 0x6f1   :  { %2899 = vadd.xlane.f32.xlu0 %v2898_v56  ;;  %v2895_v61 = vsel %vm425_vm2, %v6455_v57, 0.0 }
 0x6fa   :  { %3608 = vrot.lane.b32.xlu1 %v6057_v60, %s5876_s28  ;;  %v3373_v60 = vpop.permute.xlu0 %3372 }
 0x707   :  { %3528 = vrot.lane.b32.xlu0 %v6094_v7, %s5876_s28  ;;  %v6461_v7 = vpop.permute.xlu1 %3450 }
 0x70b   :  { %3686 = vrot.lane.b32.xlu0 %v6090_v6, %s5876_s28 }
 0x70d   :  { %v2867_v1 = vpop.xlane.xlu1 %2866 }
 0x70e   :  { %v2873_v6 = vsub.f32 %v6422_v8, %v2867_v1 }
 0x70f   :  { %3684 = vrot.lane.b32.xlu0 %v6110_v9, %s5876_s28 }
 0x710   :  { %v2884_v9 = vmul.f32 1.442695, %v2873_v6 }
 0x71e   :  { %2896 = vadd.xlane.f32.xlu1 %v2895_v61 }
 0x72f   :  { %3606 = vrot.lane.b32.xlu1 %v6068_v0, %s5876_s28 }
 0x739   :  { %v2888_v58 = vpop.xlane.xlu0 %2887 }
 0x73a   :  { %5803 = vrcp.f32 %v2888_v58 }
 0x73d   :  { %v2894_v11 = vpop.xlane.xlu0 %2893 }
 0x73e   :  { %5805 = vrcp.f32 %v2894_v11 }
 0x73f   :  { %5807 = vpow2.f32 %v2884_v9 }
 0x741   :  { %v3531_v28 = vpop.permute.xlu0 %3530 }
 0x744   :  { %v5804_v14 = vpop.eup %5803 }
 0x745   :  { %v2905_v18 = vmul.f32 %v5804_v14, %v5794_v3 }
 0x747   :  { %5531 = vmatmul.mubr.msk.f32.vlgmr.msra.gmra.mrb[34].mxu1 %vm425_vm2, %v2905_v18 }
 0x748   :  { %v5806_v25 = vpop.eup %5805  ;;  %5539 = vmatpush3.msra.mxu1 %v3069_v36  ;;  %5540 = vmatprep.mubr.msk.f32.mxu1 %vm5873_vm1, %v5872_v34 }
 0x749   :  { %v2909_v0 = vmul.f32 %v5806_v25, %v5796_v59  ;;  %5548 = vmatprep.subr.mxu1 %v5872_v34  ;;  %v5808_v8 = vpop.eup %5807 }
 0x74a   :  { %v2901_v26 = vsel %vm425_vm2, %v5808_v8, 0.0 }
 0x74b   :  { %5541 = vmatmul.mubr.msk.f32.vlgmr.msra.gmra.mrb[36].mxu1 %vm425_vm2, %v2909_v0 }
 0x74c   :  { %5549 = vmatpush3.msra.mxu1 %v6431_v20  ;;  %5550 = vmatprep.mubr.msk.f32.mxu1 %vm5873_vm1, %v5872_v34 }
 0x74d   :  { %5558 = vmatprep.subr.mxu1 %v5872_v34 }
 0x753   :  { %2902 = vadd.xlane.f32.xlu1 %v2901_v26 }
 0x764   :  { %3764 = vrot.lane.b32.xlu1 %v6066_v63, %s5876_s28 }
 0x768   :  { %3762 = vrot.lane.b32.xlu1 %v6086_v5, %s5876_s28 }
 0x776   :  { %v2891_v27 = vpop.xlane.xlu1 %2890 }
 0x777   :  { %5809 = vrcp.f32 %v2891_v27 }
 0x77a   :  { %v3609_v59 = vpop.permute.xlu1 %3608 }
 0x77e   :  { %v2900_v30 = vpop.xlane.xlu0 %2899 }
 0x77f   :  { %5811 = vrcp.f32 %v2900_v30 }
 0x781   :  { %v5810_v20 = vpop.eup %5809 }
 0x782   :  { %v2907_v31 = vmul.f32 %v5810_v20, %v5798_v52  ;;  %v3529_v32 = vpop.permute.xlu0 %3528 }
 0x784   :  { %5536 = vmatmul.mubr.msk.f32.vlgmr.msra.gmra.mrb[44].mxu0 %vm425_vm2, %v2907_v31 }
 0x785   :  { %5544 = vmatpush3.msra.mxu0 %v6439_v38  ;;  %5545 = vmatprep.mubr.msk.f32.mxu0 %vm5873_vm1, %v5872_v34 }
 0x786   :  { %5553 = vmatprep.subr.mxu0 %v5872_v34  ;;  %v3687_v5 = vpop.permute.xlu0 %3686 }
 0x789   :  { %v5812_v63 = vpop.eup %5811 }
 0x78a   :  { %v2913_v3 = vmul.f32 %v5812_v63, %v5800_v2 }
 0x78c   :  { %5551 = vmatmul.mubr.msk.f32.vlgmr.msra.gmra.mrb[38].mxu1 %vm425_vm2, %v2913_v3 }
 0x78d   :  { %5559 = vmatpush3.xpose.msk.msra.mxu1 %vm425_vm2, %v6433_v22  ;;  %5560 = vmatprep.mubr.msk.f32.mxu1 %vm5873_vm1, %v5872_v34  ;;  %v3685_v22 = vpop.permute.xlu0 %3684 }
 0x78e   :  { %5568 = vmatprep.subr.mxu1 %v5872_v34 }
 0x790   :  { %5561 = vmatmul.mubr.msk.f32.vlgmr.msra.gmra.mrb[40].mxu1 %vm425_vm2, %v3373_v60 }
 0x791   :  { %5569 = vmatpush3.xpose.msk.msra.mxu1 %vm425_vm2, %v3531_v28  ;;  %5570 = vmatprep.mubr.msk.f32.mxu1 %vm5873_vm1, %v5872_v34 }
 0x792   :  { %5578 = vmatprep.subr.mxu1 %v5872_v34 }
 0x794   :  { %5571 = vmatmul.mubr.msk.f32.vlgmr.msra.gmra.mrb[42].mxu1 %vm425_vm2, %v3529_v32 }
 0x795   :  { %5579 = vmatpush3.xpose.msk.msra.mxu1 %vm425_vm2, %v3687_v5  ;;  %5580 = vmatprep.mubr.msk.f32.mxu1 %vm5873_vm1, %v5872_v34 }
 0x796   :  { %5588 = vmatprep.subr.mxu1 %v5872_v34 }
 0x798   :  { %5581 = vmatmul.mubr.msk.f32.vlgmr.msra.gmra.mrb[44].mxu1 %vm425_vm2, %v3685_v22 }
 0x799   :  { %5590 = vmatprep.mubr.msk.f32.mxu1 %vm5873_vm1, %v5872_v34 }
 0x7ab   :  { %v2897_v33 = vpop.xlane.xlu1 %2896 }
 0x7ac   :  { %5813 = vrcp.f32 %v2897_v33 }
 0x7af   :  { %v3607_v42 = vpop.permute.xlu1 %3606 }
 0x7b6   :  { %v5814_v36 = vpop.eup %5813 }
 0x7b7   :  { %v2911_v38 = vmul.f32 %v5814_v36, %v6455_v57 }
 0x7b9   :  { %5546 = vmatmul.mubr.msk.f32.vlgmr.msra.gmra.mrb[46].mxu0 %vm425_vm2, %v2911_v38 }
 0x7ba   :  { %5554 = vmatpush3.msra.mxu0 %v6441_v41  ;;  %5555 = vmatprep.mubr.msk.f32.mxu0 %vm5873_vm1, %v5872_v34 }
 0x7bb   :  { %5563 = vmatprep.subr.mxu0 %v5872_v34 }
 0x7e0   :  { %v2903_v45 = vpop.xlane.xlu1 %2902 }
 0x7e1   :  { %5815 = vrcp.f32 %v2903_v45 }
 0x7e4   :  { %v3765_v41 = vpop.permute.xlu1 %3764 }
 0x7eb   :  { %v5816_v46 = vpop.eup %5815 }
 0x7ec   :  { %v2915_v47 = vmul.f32 %v5816_v46, %v5808_v8 }
 0x7ee   :  { %5556 = vmatmul.mubr.msk.f32.vlgmr.msra.gmra.mrb[48].mxu0 %vm425_vm2, %v2915_v47 }
 0x7ef   :  { %5564 = vmatpush3.xpose.msk.msra.mxu0 %vm425_vm2, %v6443_v44  ;;  %5565 = vmatprep.mubr.msk.f32.mxu0 %vm5873_vm1, %v5872_v34  ;;  %v3763_v44 = vpop.permute.xlu1 %3762 }
 0x7f0   :  { %5573 = vmatprep.subr.mxu0 %v5872_v34 }
 0x7f2   :  { %5566 = vmatmul.mubr.msk.f32.vlgmr.msra.gmra.mrb[50].mxu0 %vm425_vm2, %v6461_v7 }
 0x7f3   :  { %5574 = vmatpush3.xpose.msk.msra.mxu0 %vm425_vm2, %v3609_v59  ;;  %5575 = vmatprep.mubr.msk.f32.mxu0 %vm5873_vm1, %v5872_v34 }
 0x7f4   :  { %5583 = vmatprep.subr.mxu0 %v5872_v34 }
 0x7f6   :  { %5576 = vmatmul.mubr.msk.f32.vlgmr.msra.gmra.mrb[52].mxu0 %vm425_vm2, %v3607_v42 }
 0x7f7   :  { %5584 = vmatpush3.xpose.msk.msra.mxu0 %vm425_vm2, %v3765_v41  ;;  %5585 = vmatprep.mubr.msk.f32.mxu0 %vm5873_vm1, %v5872_v34 }
 0x7f8   :  { %5593 = vmatprep.subr.mxu0 %v5872_v34 }
 0x7fa   :  { %5586 = vmatmul.mubr.msk.f32.vlgmr.msra.gmra.mrb[54].mxu0 %vm425_vm2, %v3763_v44 }
 0x7fb   :  { %5595 = vmatprep.mubr.msk.f32.mxu0 %vm5873_vm1, %v5872_v34 }
 0x81a   :  { %v6528_v48 = vpop.f32.mrb[34].mxu1 }
 0x81b   :  { %v5532_v49 = vpop.f32.mrb[35].mxu1 }
 0x81e   :  { %v6530_v50 = vpop.f32.mrb[36].mxu1 }
 0x81f   :  { %v5542_v52 = vpop.f32.mrb[37].mxu1 }
 0x857   :  { %v6532_v53 = vpop.f32.mrb[44].mxu0 }
 0x858   :  { %v5537_v2 = vpop.f32.mrb[45].mxu0 }
 0x85f   :  { %v6534_v56 = vpop.f32.mrb[38].mxu1 }
 0x860   :  { %v5552_v54 = vpop.f32.mrb[39].mxu1 }
 0x863   :  { %v3446_v51 = vpop.f32.mrb[40].mxu1 }
 0x864   :  { %v5562_v57 = vpop.f32.mrb[41].mxu1  ;;  %v3840_v61 = vsel %vm425_vm2, %v3446_v51, -inf }
 0x865   :  { %3841 = vmax.xlane.f32.xlu0 %v3840_v61 }
 0x867   :  { %v3602_v60 = vpop.f32.mrb[42].mxu1 }
 0x868   :  { %v5572_v7 = vpop.f32.mrb[43].mxu1  ;;  %v3846_v58 = vsel %vm425_vm2, %v3602_v60, -inf }
 0x869   :  { %3847 = vmax.xlane.f32.xlu0 %v3846_v58 }
 0x86b   :  { %v3758_v1 = vpop.f32.mrb[44].mxu1 }
 0x86c   :  { %v5582_v6 = vpop.f32.mrb[45].mxu1  ;;  %v3852_v63 = vsel %vm425_vm2, %v3758_v1, -inf }
 0x88c   :  { %v6538_v11 = vpop.f32.mrb[46].mxu0 }
 0x88d   :  { %v5547_v9 = vpop.f32.mrb[47].mxu0 }
 0x8c1   :  { %v6540_v14 = vpop.f32.mrb[48].mxu0 }
 0x8c2   :  { %v5557_v18 = vpop.f32.mrb[49].mxu0 }
 0x8c5   :  { %v3524_v25 = vpop.f32.mrb[50].mxu0 }
 0x8c6   :  { %v5567_v0 = vpop.f32.mrb[51].mxu0  ;;  %v3843_v8 = vsel %vm425_vm2, %v3524_v25, -inf }
 0x8c7   :  { %3844 = vmax.xlane.f32.xlu1 %v3843_v8 }
 0x8c9   :  { %v3680_v26 = vpop.f32.mrb[52].mxu0 }
 0x8ca   :  { %v5577_v27 = vpop.f32.mrb[53].mxu0  ;;  %v3849_v28 = vsel %vm425_vm2, %v3680_v26, -inf }
 0x8cb   :  { %3850 = vmax.xlane.f32.xlu0 %v3849_v28 }
 0x8cd   :  { %v3836_v30 = vpop.f32.mrb[54].mxu0 }
 0x8ce   :  { %v5587_v20 = vpop.f32.mrb[55].mxu0  ;;  %v3855_v31 = vsel %vm425_vm2, %v3836_v30, -inf }
 0x8cf   :  { %3856 = vmax.xlane.f32.xlu1 %v3855_v31  ;;  %3853 = vmax.xlane.f32.xlu0 %v3852_v63 }
 0x8e0   :  { %3982 = vrot.lane.b32.xlu1 %v6118_v13, %s5876_s28 }
 0x8e4   :  { %4058 = vrot.lane.b32.xlu1 %v6128_v19, %s5876_s28 }
 0x8e5   :  { %3906 = vrot.lane.b32.xlu0 %v6120_v15, %s5876_s28 }
 0x8e8   :  { %4134 = vrot.lane.b32.xlu1 %v6125_v17, %s5876_s28 }
 0x8f2   :  { %v3842_v3 = vpop.xlane.xlu0 %3841 }
 0x8f3   :  { %v3858_v32 = vsub.f32 %v3446_v51, %v3842_v3 }
 0x8f5   :  { %v3864_v5 = vmul.f32 1.442695, %v3858_v32 }
 0x8f6   :  { %v3848_v22 = vpop.xlane.xlu0 %3847 }
 0x8f7   :  { %5817 = vpow2.f32 %v3864_v5  ;;  %v3860_v59 = vsub.f32 %v3602_v60, %v3848_v22 }
 0x8f9   :  { %v3868_v33 = vmul.f32 1.442695, %v3860_v59 }
 0x8fb   :  { %5819 = vpow2.f32 %v3868_v33 }
 0x901   :  { %v5818_v36 = vpop.eup %5817 }
 0x902   :  { %v3876_v13 = vsel %vm425_vm2, %v5818_v36, 0.0 }
 0x904   :  { %3877 = vadd.xlane.f32.xlu0 %v3876_v13 }
 0x905   :  { %v6555_v38 = vpop.eup %5819 }
 0x906   :  { %v3882_v15 = vsel %vm425_vm2, %v6555_v38, 0.0 }
 0x908   :  { %3883 = vadd.xlane.f32.xlu0 %v3882_v15 }
 0x954   :  { %v3845_v19 = vpop.xlane.xlu1 %3844 }
 0x955   :  { %v3859_v17 = vsub.f32 %v3524_v25, %v3845_v19 }
 0x957   :  { %v3866_v42 = vmul.f32 1.442695, %v3859_v17 }
 0x958   :  { %v3851_v45 = vpop.xlane.xlu0 %3850 }
 0x959   :  { %5821 = vpow2.f32 %v3866_v42  ;;  %v3861_v46 = vsub.f32 %v3680_v26, %v3851_v45 }
 0x95b   :  { %v3870_v47 = vmul.f32 1.442695, %v3861_v46 }
 0x95c   :  { %v3857_v41 = vpop.xlane.xlu1 %3856  ;;  %v3854_v44 = vpop.xlane.xlu0 %3853 }
 0x95d   :  { %5823 = vpow2.f32 %v3870_v47  ;;  %v3863_v49 = vsub.f32 %v3836_v30, %v3857_v41  ;;  %v3862_v52 = vsub.f32 %v3758_v1, %v3854_v44  ;;  %v4454_v41 = vld [vmem:[%s6825_s4] sm:$0xff]  ;;  %v4455_v44 = vld [vmem:[%s6825_s4 + $0x8] sm:$0xff] }
 0x95f   :  { %v3874_v2 = vmul.f32 1.442695, %v3863_v49  ;;  %v3872_v54 = vmul.f32 1.442695, %v3862_v52  ;;  %v5701_v49 = vpack.c.bf16 %v4455_v44, %v4454_v41 }
 0x960   :  { %v3983_v51 = vpop.permute.xlu1 %3982  ;;  %v3907_v57 = vpop.permute.xlu0 %3906 }
 0x961   :  { %5825 = vpow2.f32 %v3874_v2  ;;  %5589 = vmatpush3.msra.mxu1 %v3907_v57  ;;  %5594 = vmatpush3.msra.mxu0 %v3983_v51 }
 0x962   :  { %5827 = vpow2.f32 %v3872_v54  ;;  %5598 = vmatprep.subr.mxu1 %v5872_v34  ;;  %5603 = vmatprep.subr.mxu0 %v5872_v34 }
 0x963   :  { %v5822_v61 = vpop.eup %5821 }
 0x964   :  { %v3879_v60 = vsel %vm425_vm2, %v5822_v61, 0.0 }
 0x965   :  { %3880 = vadd.xlane.f32.xlu1 %v3879_v60 }
 0x967   :  { %v5824_v7 = vpop.eup %5823 }
 0x968   :  { %v3885_v58 = vsel %vm425_vm2, %v5824_v7, 0.0 }
 0x969   :  { %3886 = vadd.xlane.f32.xlu1 %v3885_v58 }
 0x96b   :  { %v6563_v1 = vpop.eup %5825 }
 0x96c   :  { %v6565_v6 = vpop.eup %5827  ;;  %v3891_v9 = vsel %vm425_vm2, %v6563_v1, 0.0 }
 0x96d   :  { %3892 = vadd.xlane.f32.xlu1 %v3891_v9  ;;  %v3888_v18 = vsel %vm425_vm2, %v6565_v6, 0.0 }
 0x96e   :  { %3889 = vadd.xlane.f32.xlu0 %v3888_v18 }
 0x97e   :  { %4286 = vrot.lane.b32.xlu1 %v6130_v21, %s5876_s28 }
 0x982   :  { %4370 = vrot.lane.b32.xlu1 %v6410_v40, %s5877_s29 }
 0x984   :  { %4210 = vrot.lane.b32.xlu0 %v6132_v23, %s5876_s28 }
 0x986   :  { %4394 = vrot.lane.b32.xlu1 %v6532_v53, %s5878_s30 }
 0x988   :  { %4368 = vrot.lane.b32.xlu0 %v6406_v35, %s5877_s29 }
 0x98a   :  { %4374 = vrot.lane.b32.xlu1 %v6412_v43, %s5877_s29  ;;  %v4059_v43 = vpop.permute.xlu1 %4058 }
 0x98c   :  { %4392 = vrot.lane.b32.xlu0 %v6528_v48, %s5878_s30 }
 0x98e   :  { %4398 = vrot.lane.b32.xlu1 %v6538_v11, %s5878_s30 }
 0x990   :  { %4372 = vrot.lane.b32.xlu0 %v6408_v37, %s5877_s29 }
 0x991   :  { %v3878_v21 = vpop.xlane.xlu0 %3877 }
 0x992   :  { %5829 = vrcp.f32 %v3878_v21  ;;  %4378 = vrot.lane.b32.xlu1 %v6418_v62, %s5877_s29 }
 0x994   :  { %4396 = vrot.lane.b32.xlu0 %v6530_v50, %s5878_s30 }
 0x995   :  { %v3884_v23 = vpop.xlane.xlu0 %3883 }
 0x996   :  { %5831 = vrcp.f32 %v3884_v23  ;;  %4402 = vrot.lane.b32.xlu1 %v6540_v14, %s5878_s30 }
 0x998   :  { %4376 = vrot.lane.b32.xlu0 %v6414_v55, %s5877_s29  ;;  %v4135_v55 = vpop.permute.xlu1 %4134 }
 0x99c   :  { %v5830_v35 = vpop.eup %5829  ;;  %4400 = vrot.lane.b32.xlu0 %v6534_v56, %s5878_s30 }
 0x99d   :  { %v3895_v40 = vmul.f32 %v5830_v35, %v5818_v36 }
 0x99f   :  { %5591 = vmatmul.mubr.msk.f32.vlgmr.msra.gmra.mrb[46].mxu1 %vm425_vm2, %v3895_v40 }
 0x9a0   :  { %v5832_v37 = vpop.eup %5831  ;;  %5599 = vmatpush3.msra.mxu1 %v4059_v43  ;;  %5600 = vmatprep.mubr.msk.f32.mxu1 %vm5873_vm1, %v5872_v34 }
 0x9a1   :  { %v3899_v62 = vmul.f32 %v5832_v37, %v6555_v38  ;;  %5608 = vmatprep.subr.mxu1 %v5872_v34 }
 0x9a3   :  { %5601 = vmatmul.mubr.msk.f32.vlgmr.msra.gmra.mrb[48].mxu1 %vm425_vm2, %v3899_v62 }
 0x9a4   :  { %5610 = vmatprep.mubr.msk.f32.mxu1 %vm5873_vm1, %v5872_v34 }
 0x9f2   :  { %v3881_v48 = vpop.xlane.xlu1 %3880 }
 0x9f3   :  { %5833 = vrcp.f32 %v3881_v48 }
 0x9f6   :  { %v3887_v50 = vpop.xlane.xlu1 %3886 }
 0x9f7   :  { %5835 = vrcp.f32 %v3887_v50 }
 0x9fa   :  { %v3893_v53 = vpop.xlane.xlu1 %3892 }
 0x9fb   :  { %5837 = vrcp.f32 %v3893_v53  ;;  %v3890_v56 = vpop.xlane.xlu0 %3889 }
 0x9fc   :  { %5839 = vrcp.f32 %v3890_v56 }
 0x9fd   :  { %v5834_v11 = vpop.eup %5833 }
 0x9fe   :  { %v3897_v14 = vmul.f32 %v5834_v11, %v5822_v61  ;;  %v4287_v25 = vpop.permute.xlu1 %4286 }
 0x9ff   :  { %v4211_v0 = vpop.permute.xlu0 %4210 }
 0xa00   :  { %5609 = vmatpush3.msra.mxu1 %v4211_v0  ;;  %5596 = vmatmul.mubr.msk.f32.vlgmr.msra.gmra.mrb[56].mxu0 %vm425_vm2, %v3897_v14  ;;  %v4460_v14 = vsub.s32 3, %v6044_v39 }
 0xa01   :  { %v5836_v8 = vpop.eup %5835  ;;  %5604 = vmatpush3.msra.mxu0 %v4135_v55  ;;  %5605 = vmatprep.mubr.msk.f32.mxu0 %vm5873_vm1, %v5872_v34 }
 0xa02   :  { %v3901_v26 = vmul.f32 %v5836_v8, %v5824_v7  ;;  %v4371_v27 = vpop.permute.xlu1 %4370  ;;  %5613 = vmatprep.subr.mxu0 %v5872_v34  ;;  %5702 = vmatprep.subr.bf16.mxu1 %v5701_v49 }
 0xa03   :  { %v6599_v28 = vpop.permute.xlu0 %4368  ;;  %v4435_v63 = vsel %vm425_vm2, %v6246_v16, %v4371_v27 }
 0xa04   :  { %5606 = vmatmul.mubr.msk.f32.vlgmr.msra.gmra.mrb[58].mxu0 %vm425_vm2, %v3901_v26  ;;  %v4434_v21 = vsel %vm425_vm2, %v6240_v4, %v6599_v28 }
 0xa05   :  { %v5838_v30 = vpop.eup %5837  ;;  %5614 = vmatpush3.msra.mxu0 %v4287_v25  ;;  %5615 = vmatprep.mubr.msk.f32.mxu0 %vm5873_vm1, %v5872_v34  ;;  %v6655_v25 = vld [vmem:[%s6824_s7] sm:$0xff] }
 0xa06   :  { %v5840_v20 = vpop.eup %5839  ;;  %v3905_v31 = vmul.f32 %v5838_v30, %v6563_v1  ;;  %v4395_v3 = vpop.permute.xlu1 %4394  ;;  %v4461_v0 = vrot.slane %v6655_v25, %v4460_v14  ;;  %v5866_v30 = vld [vmem:[%s6821_s0 + $0x8] sm:$0xff]  ;;  %v4680_v14 = vld [vmem:[%s6826_s5] sm:$0xff] }
 0xa07   :  { %v3903_v32 = vmul.f32 %v5840_v20, %v6565_v6  ;;  %v4442_v5 = vsel %vm4440_vm3, %v4435_v63, %v4395_v3  ;;  %v4393_v22 = vpop.permute.xlu0 %4392 }
 0xa08   :  { %5616 = vmatmul.mubr.msk.f32.vlgmr.msra.gmra.mrb[60].mxu0 %vm425_vm2, %v3905_v31  ;;  %v4441_v23 = vsel %vm4440_vm3, %v4434_v21, %v4393_v22  ;;  %v5867_v31 = vld [vmem:[%s6821_s0] sm:$0xff] }
 0xa09   :  { %5611 = vmatmul.mubr.msk.f32.vlgmr.msra.gmra.mrb[50].mxu1 %vm425_vm2, %v3903_v32 }
 0xa0a   :  { %v4375_v59 = vpop.permute.xlu1 %4374  ;;  %5704 = vmatpush3.bf16.msra.mxu1 %v5701_v49 }
 0xa0b   :  { %v4373_v33 = vpop.permute.xlu0 %4372  ;;  %v4437_v36 = vsel %vm425_vm2, %v6248_v24, %v4375_v59 }
 0xa0c   :  { %v4436_v34 = vsel %vm425_vm2, %v6242_v10, %v4373_v33 }
 0xa0e   :  { %v4399_v13 = vpop.permute.xlu1 %4398 }
 0xa0f   :  { %v4444_v16 = vsel %vm4440_vm3, %v4437_v36, %v4399_v13  ;;  %v4397_v38 = vpop.permute.xlu0 %4396 }
 0xa10   :  { %v4443_v15 = vsel %vm4440_vm3, %v4436_v34, %v4397_v38  ;;  %v5868_v34 = vld [vmem:[%s6821_s0 + $0x18] sm:$0xff] }
 0xa12   :  { %v4379_v19 = vpop.permute.xlu1 %4378 }
 0xa13   :  { %v4377_v17 = vpop.permute.xlu0 %4376  ;;  %v4439_v45 = vsel %vm425_vm2, %v6251_v29, %v4379_v19  ;;  %v4457_v29 = vld [vmem:[%s6825_s4 + $0x18] sm:$0xff] }
 0xa14   :  { %v4438_v42 = vsel %vm425_vm2, %v6244_v12, %v4377_v17  ;;  %v4456_v12 = vld [vmem:[%s6825_s4 + $0x10] sm:$0xff] }
 0xa15   :  { %v5705_v52 = vpack.c.bf16 %v4457_v29, %v4456_v12 }
 0xa16   :  { %v4403_v46 = vpop.permute.xlu1 %4402 }
 0xa17   :  { %v4446_v10 = vsel %vm4440_vm3, %v4439_v45, %v4403_v46  ;;  %v4401_v47 = vpop.permute.xlu0 %4400  ;;  %5706 = vmatprep.subr.bf16.mxu1 %v5705_v52  ;;  %v5870_v45 = vld [vmem:[%s6821_s0 + $0x28] sm:$0xff] }
 0xa18   :  { %v4445_v24 = vsel %vm4440_vm3, %v4438_v42, %v4401_v47  ;;  %5708 = vmatpush3.bf16.msra.mxu1 %v5705_v52 }
 0xa72   :  { %v3978_v2 = vpop.f32.mrb[46].mxu1 }
 0xa73   :  { %4416 = vrot.lane.b32.xlu0 %v3978_v2, %s5879_s17  ;;  %v5592_v54 = vpop.f32.mrb[47].mxu1 }
 0xa76   :  { %v4130_v51 = vpop.f32.mrb[48].mxu1 }
 0xa77   :  { %4420 = vrot.lane.b32.xlu0 %v4130_v51, %s5879_s17  ;;  %v5602_v57 = vpop.f32.mrb[49].mxu1 }
 0xad3   :  { %v4054_v61 = vpop.f32.mrb[56].mxu0 }
 0xad4   :  { %v5597_v60 = vpop.f32.mrb[57].mxu0  ;;  %4418 = vrot.lane.b32.xlu1 %v4054_v61, %s5879_s17 }
 0xad7   :  { %v4206_v7 = vpop.f32.mrb[58].mxu0 }
 0xad8   :  { %4422 = vrot.lane.b32.xlu1 %v4206_v7, %s5879_s17  ;;  %v5607_v58 = vpop.f32.mrb[59].mxu0 }
 0xadb   :  { %v4358_v1 = vpop.f32.mrb[60].mxu0 }
 0xadc   :  { %v4282_v6 = vpop.f32.mrb[50].mxu1  ;;  %4426 = vrot.lane.b32.xlu1 %v4358_v1, %s5879_s17  ;;  %v5617_v9 = vpop.f32.mrb[61].mxu0 }
 0xadd   :  { %4424 = vrot.lane.b32.xlu0 %v4282_v6, %s5879_s17  ;;  %v5612_v18 = vpop.f32.mrb[51].mxu1 }
 0xae5   :  { %v4417_v35 = vpop.permute.xlu0 %4416 }
 0xae6   :  { %v4448_v40 = vsel %vm4447_vm4, %v4441_v23, %v4417_v35 }
 0xae7   :  { %5626 = vmatprep.mubr.msk.f32.mxu1 %vm49_vm0, %v4448_v40 }
 0xae9   :  { %v4421_v43 = vpop.permute.xlu0 %4420 }
 0xaea   :  { %v4450_v55 = vsel %vm4447_vm4, %v4443_v15, %v4421_v43 }
 0xb46   :  { %v4419_v37 = vpop.permute.xlu1 %4418 }
 0xb47   :  { %v4449_v62 = vsel %vm4447_vm4, %v4442_v5, %v4419_v37 }
 0xb48   :  { %5627 = vmatmul.mubr.msk.f32.vlgmr.msra.gmra.mrb[52].mxu1 %vm49_vm0, %v4449_v62 }
 0xb49   :  { %5629 = vmatprep.mubr.msk.f32.mxu1 %vm49_vm0, %v4450_v55 }
 0xb4a   :  { %v4423_v48 = vpop.permute.xlu1 %4422 }
 0xb4b   :  { %v4451_v4 = vsel %vm4447_vm4, %v4444_v16, %v4423_v48  ;;  %v5869_v16 = vld [vmem:[%s6821_s0 + $0x10] sm:$0xff] }
 0xb4c   :  { %5630 = vmatmul.mubr.msk.f32.gmra.mrb[54].mxu1 %vm49_vm0, %v4451_v4 }
 0xb4e   :  { %v4427_v50 = vpop.permute.xlu1 %4426 }
 0xb4f   :  { %v4453_v53 = vsel %vm4447_vm4, %v4446_v10, %v4427_v50  ;;  %v4425_v56 = vpop.permute.xlu0 %4424  ;;  %v5871_v10 = vld [vmem:[%s6821_s0 + $0x20] sm:$0xff] }
 0xb50   :  { %v4452_v11 = vsel %vm4447_vm4, %v4445_v24, %v4425_v56 }
 0xb51   :  { %5632 = vmatprep.mubr.msk.f32.mxu1 %vm49_vm0, %v4452_v11 }
 0xb52   :  { %5633 = vmatmul.mubr.msk.f32.gmra.mrb[56].mxu1 %vm49_vm0, %v4453_v53 }
 0xc1b   :  { %v5628_v8 = vpop.f32.mrb[52].mxu1 }
 0xc1c   :  { %v4552_v26 = vadd.f32 %v5628_v8, %v4461_v0  ;;  %v4546_v27 = vpop.f32.mrb[53].mxu1 }
 0xc1d   :  { %v4547_v28 = vadd.f32 %v4546_v27, %v4461_v0  ;;  %v4683_v27 = vld [vmem:[%s6826_s5 + $0x18] sm:$0xff] }
 0xc1e   :  { %v4576_v20 = vadd.f32 %v5866_v30, %v4552_v26  ;;  %v4682_v26 = vld [vmem:[%s6826_s5 + $0x10] sm:$0xff]  ;;  %v4809_v30 = vld [vmem:[%s6827_s6] sm:$0xff] }
 0xc1f   :  { %v4575_v63 = vadd.f32 %v5867_v31, %v4547_v28  ;;  %v5631_v3 = vpop.f32.mrb[54].mxu1  ;;  %v5713_v28 = vpack.c.bf16 %v4683_v27, %v4682_v26  ;;  %v4811_v31 = vld [vmem:[%s6827_s6 + $0x10] sm:$0xff] }
 0xc20   :  { %v4562_v32 = vadd.f32 %v5631_v3, %v4461_v0  ;;  %v4556_v5 = vpop.f32.mrb[55].mxu1  ;;  %v4584_v22 = vsel %vm49_vm0, %v4576_v20, 0.0  ;;  %v4812_v3 = vld [vmem:[%s6827_s6 + $0x18] sm:$0xff] }
 0xc21   :  { %v4557_v59 = vadd.f32 %v4556_v5, %v4461_v0  ;;  %4585 = vadd.xlane.f32.xlu1 %v4584_v22  ;;  %v4581_v33 = vsel %vm49_vm0, %v4575_v63, 0.0  ;;  %v4813_v5 = vld [vmem:[%s6827_s6 + $0x20] sm:$0xff]  ;;  %v4814_v22 = vld [vmem:[%s6827_s6 + $0x28] sm:$0xff] }
 0xc22   :  { %v4578_v36 = vadd.f32 %v5868_v34, %v4562_v32  ;;  %4582 = vadd.xlane.f32.xlu0 %v4581_v33  ;;  %v5721_v32 = vpack.c.bf16 %v4812_v3, %v4811_v31 }
 0xc23   :  { %v4577_v38 = vadd.f32 %v5869_v16, %v4557_v59  ;;  %v5725_v59 = vpack.c.bf16 %v4814_v22, %v4813_v5 }
 0xc24   :  { %v4590_v13 = vsel %vm49_vm0, %v4578_v36, 0.0 }
 0xc25   :  { %v5634_v15 = vpop.f32.mrb[56].mxu1  ;;  %v4587_v24 = vsel %vm49_vm0, %v4577_v38, 0.0 }
 0xc26   :  { %v4572_v19 = vadd.f32 %v5634_v15, %v4461_v0  ;;  %v4566_v17 = vpop.f32.mrb[57].mxu1  ;;  %4591 = vadd.xlane.f32.xlu0 %v4590_v13 }
 0xc27   :  { %v4567_v42 = vadd.f32 %v4566_v17, %v4461_v0  ;;  %v4681_v0 = vld [vmem:[%s6826_s5 + $0x8] sm:$0xff] }
 0xc28   :  { %v4580_v46 = vadd.f32 %v5870_v45, %v4572_v19  ;;  %v5709_v8 = vpack.c.bf16 %v4681_v0, %v4680_v14 }
 0xc29   :  { %v4579_v47 = vadd.f32 %v5871_v10, %v4567_v42  ;;  %v4662_v10 = vsub.s32 4, %v6044_v39 }
 0xc2a   :  { %v4596_v41 = vsel %vm49_vm0, %v4580_v46, 0.0  ;;  %4588 = vadd.xlane.f32.xlu0 %v4587_v24  ;;  %5710 = vmatprep.subr.bf16.mxu0 %v5709_v8 }
 0xc2b   :  { %4597 = vadd.xlane.f32.xlu1 %v4596_v41  ;;  %v4593_v44 = vsel %vm49_vm0, %v4579_v47, 0.0  ;;  %5712 = vmatpush3.bf16.msra.mxu0 %v5709_v8  ;;  %v5153_v8 = vld [vmem:[%s6828_s8] ss:$0 sm:$0xff] }
 0xc2c   :  { %5714 = vmatprep.subr.bf16.mxu0 %v5713_v28 }
 0xc2e   :  { %4594 = vadd.xlane.f32.xlu0 %v4593_v44 }
 0xc2f   :  { %5716 = vmatpush3.bf16.msra.mxu0 %v5713_v28 }
 0xcae   :  { %v4586_v12 = vpop.xlane.xlu1 %4585 }
 0xcaf   :  { %v4601_v49 = vmul.f32 0.03125, %v4586_v12  ;;  %v4583_v29 = vpop.xlane.xlu0 %4582  ;;  %v4672_v12 = vsub.s32 5, %v6044_v39 }
 0xcb0   :  { %v4600_v52 = vmul.f32 0.03125, %v4583_v29  ;;  %v4663_v29 = vrot.slane %v6655_v25, %v4662_v10 }
 0xcb1   :  { %v6682_v2 = vsub.f32 %v4576_v20, %v4601_v49  ;;  %v4810_v20 = vld [vmem:[%s6827_s6 + $0x8] sm:$0xff] }
 0xcb2   :  { %v6684_v54 = vsub.f32 %v4575_v63, %v4600_v52  ;;  %v5717_v63 = vpack.c.bf16 %v4810_v20, %v4809_v30 }
 0xcb3   :  { %v4592_v51 = vpop.xlane.xlu0 %4591  ;;  %v4613_v57 = vmul.f32 %v6682_v2, %v6682_v2 }
 0xcb4   :  { %v4603_v61 = vmul.f32 0.03125, %v4592_v51  ;;  %v4612_v60 = vmul.f32 %v6684_v54, %v6684_v54  ;;  %5718 = vmatprep.subr.bf16.mxu1 %v5717_v63 }
 0xcb5   :  { %v4621_v7 = vsel %vm49_vm0, %v4613_v57, 0.0  ;;  %5720 = vmatpush3.bf16.msra.mxu1 %v5717_v63 }
 0xcb6   :  { %v6691_v58 = vsub.f32 %v4578_v36, %v4603_v61  ;;  %4622 = vadd.xlane.f32.xlu1 %v4621_v7  ;;  %v4618_v1 = vsel %vm49_vm0, %v4612_v60, 0.0  ;;  %5722 = vmatprep.subr.bf16.mxu1 %v5721_v32  ;;  %v4673_v7 = vrot.slane %v6655_v25, %v4672_v12 }
 0xcb7   :  { %4619 = vadd.xlane.f32.xlu0 %v4618_v1  ;;  %v4589_v6 = vpop.xlane.xlu0 %4588 }
 0xcb8   :  { %v4598_v9 = vpop.xlane.xlu1 %4597  ;;  %v4602_v18 = vmul.f32 0.03125, %v4589_v6  ;;  %v4615_v21 = vmul.f32 %v6691_v58, %v6691_v58 }
 0xcb9   :  { %v4605_v23 = vmul.f32 0.03125, %v4598_v9  ;;  %5724 = vmatpush3.bf16.msra.mxu1 %v5721_v32 }
 0xcba   :  { %v6696_v35 = vsub.f32 %v4577_v38, %v4602_v18  ;;  %v4627_v40 = vsel %vm49_vm0, %v4615_v21, 0.0  ;;  %5726 = vmatprep.subr.bf16.mxu1 %v5725_v59 }
 0xcbb   :  { %v6699_v43 = vsub.f32 %v4580_v46, %v4605_v23  ;;  %4628 = vadd.xlane.f32.xlu1 %v4627_v40  ;;  %v4595_v37 = vpop.xlane.xlu0 %4594 }
 0xcbc   :  { %v4604_v62 = vmul.f32 0.03125, %v4595_v37  ;;  %v4614_v55 = vmul.f32 %v6696_v35, %v6696_v35 }
 0xcbd   :  { %v4617_v48 = vmul.f32 %v6699_v43, %v6699_v43  ;;  %5728 = vmatpush3.bf16.msra.mxu1 %v5725_v59 }
 0xcbe   :  { %v6705_v4 = vsub.f32 %v4579_v47, %v4604_v62  ;;  %v4624_v50 = vsel %vm49_vm0, %v4614_v55, 0.0 }
 0xcbf   :  { %v4633_v53 = vsel %vm49_vm0, %v4617_v48, 0.0  ;;  %4625 = vadd.xlane.f32.xlu0 %v4624_v50 }
 0xcc0   :  { %4634 = vadd.xlane.f32.xlu1 %v4633_v53  ;;  %v4616_v56 = vmul.f32 %v6705_v4, %v6705_v4 }
 0xcc2   :  { %v4630_v11 = vsel %vm49_vm0, %v4616_v56, 0.0 }
 0xcc3   :  { %4631 = vadd.xlane.f32.xlu0 %v4630_v11 }
 0xd43   :  { %v4623_v33 = vpop.xlane.xlu1 %4622 }
 0xd44   :  { %v4637_v34 = vmul.f32 0.03125, %v4623_v33  ;;  %v4620_v36 = vpop.xlane.xlu0 %4619 }
 0xd45   :  { %v4636_v13 = vmul.f32 0.03125, %v4620_v36 }
 0xd46   :  { %v4643_v16 = vadd.f32 1e-05, %v4637_v34 }
 0xd47   :  { %v4642_v38 = vadd.f32 1e-05, %v4636_v13 }
 0xd48   :  { %5841 = vrsqrt.f32 %v4643_v16  ;;  %v4629_v15 = vpop.xlane.xlu1 %4628 }
 0xd49   :  { %5843 = vrsqrt.f32 %v4642_v38  ;;  %v4639_v19 = vmul.f32 0.03125, %v4629_v15  ;;  %v4819_v15 = vsub.s32 6, %v6044_v39 }
 0xd4b   :  { %v4645_v17 = vadd.f32 1e-05, %v4639_v19  ;;  %v4820_v19 = vrot.slane %v6655_v25, %v4819_v15 }
 0xd4c   :  { %v4626_v42 = vpop.xlane.xlu0 %4625 }
 0xd4d   :  { %5845 = vrsqrt.f32 %v4645_v17  ;;  %v4635_v45 = vpop.xlane.xlu1 %4634  ;;  %v4638_v46 = vmul.f32 0.03125, %v4626_v42 }
 0xd4e   :  { %v4641_v47 = vmul.f32 0.03125, %v4635_v45 }
 0xd4f   :  { %v4644_v24 = vadd.f32 1e-05, %v4638_v46 }
 0xd50   :  { %v4647_v41 = vadd.f32 1e-05, %v4641_v47  ;;  %v4632_v44 = vpop.xlane.xlu0 %4631 }
 0xd51   :  { %5847 = vrsqrt.f32 %v4644_v24  ;;  %v4640_v49 = vmul.f32 0.03125, %v4632_v44 }
 0xd52   :  { %v5842_v52 = vpop.eup %5841  ;;  %5849 = vrsqrt.f32 %v4647_v41 }
 0xd53   :  { %v5844_v51 = vpop.eup %5843  ;;  %v4655_v57 = vmul.f32 %v5842_v52, %v6682_v2  ;;  %v4646_v61 = vadd.f32 1e-05, %v4640_v49 }
 0xd54   :  { %v4654_v60 = vmul.f32 %v5844_v51, %v6684_v54 }
 0xd55   :  { %5851 = vrsqrt.f32 %v4646_v61  ;;  %v4665_v1 = vmul.f32 %v4663_v29, %v4655_v57 }
 0xd56   :  { %v4664_v6 = vmul.f32 %v4663_v29, %v4654_v60 }
 0xd57   :  { %v5846_v9 = vpop.eup %5845  ;;  %v4675_v21 = vadd.f32 %v4673_v7, %v4665_v1 }
 0xd58   :  { %v4674_v18 = vadd.f32 %v4673_v7, %v4664_v6  ;;  %v4657_v23 = vmul.f32 %v5846_v9, %v6691_v58 }
 0xd5a   :  { %5643 = vmatprep.mubr.msk.f32.mxu0 %vm49_vm0, %v4674_v18  ;;  %v4667_v62 = vmul.f32 %v4663_v29, %v4657_v23 }
 0xd5b   :  { %v5848_v40 = vpop.eup %5847  ;;  %5644 = vmatmul.mubr.msk.f32.vlgmr.msra.gmra.mrb[62].mxu0 %vm49_vm0, %v4675_v21 }
 0xd5c   :  { %v5850_v37 = vpop.eup %5849  ;;  %v4656_v2 = vmul.f32 %v5848_v40, %v6696_v35  ;;  %v4677_v56 = vadd.f32 %v4673_v7, %v4667_v62  ;;  %v4815_v35 = vld [vmem:[%s6827_s6 + $0x30] sm:$0xff] }
 0xd5d   :  { %v4659_v54 = vmul.f32 %v5850_v37, %v6699_v43  ;;  %v4816_v43 = vld [vmem:[%s6827_s6 + $0x38] sm:$0xff] }
 0xd5e   :  { %v4666_v55 = vmul.f32 %v4663_v29, %v4656_v2 }
 0xd5f   :  { %v5852_v48 = vpop.eup %5851  ;;  %v4669_v11 = vmul.f32 %v4663_v29, %v4659_v54 }
 0xd60   :  { %v4676_v50 = vadd.f32 %v4673_v7, %v4666_v55  ;;  %v4658_v53 = vmul.f32 %v5852_v48, %v6705_v4  ;;  %v5729_v4 = vpack.c.bf16 %v4816_v43, %v4815_v35 }
 0xd61   :  { %v4679_v0 = vadd.f32 %v4673_v7, %v4669_v11 }
 0xd62   :  { %5646 = vmatprep.mubr.msk.f32.mxu0 %vm49_vm0, %v4676_v50  ;;  %v4668_v58 = vmul.f32 %v4663_v29, %v4658_v53  ;;  %5730 = vmatprep.subr.bf16.mxu1 %v5729_v4 }
 0xd63   :  { %5647 = vmatmul.mubr.msk.f32.gmra.mrb[64].mxu0 %vm49_vm0, %v4677_v56  ;;  %5732 = vmatpush3.bf16.msra.mxu1 %v5729_v4 }
 0xd64   :  { %v6756_v14 = vadd.f32 %v4673_v7, %v4668_v58 }
 0xd66   :  { %5649 = vmatprep.mubr.msk.f32.mxu0 %vm49_vm0, %v6756_v14 }
 0xd67   :  { %5650 = vmatmul.mubr.msk.f32.gmra.mrb[66].mxu0 %vm49_vm0, %v4679_v0 }
 0xe2e   :  { %v5645_v26 = vpop.f32.mrb[62].mxu0 }
 0xe2f   :  { %v4780_v27 = vadd.f32 %v5645_v26, %v5153_v8  ;;  %v4774_v28 = vpop.f32.mrb[63].mxu0 }
 0xe30   :  { %v4775_v30 = vadd.f32 %v5153_v8, %v4774_v28 }
 0xe31   :  { %v4804_v31 = vmax.f32 %v4780_v27, 0.0 }
 0xe32   :  { %v4803_v20 = vmax.f32 %v4775_v30, 0.0 }
 0xe34   :  { %5668 = vmatprep.mubr.msk.f32.mxu1 %vm4821_vm5, %v4803_v20 }
 0xe35   :  { %5669 = vmatmul.mubr.msk.f32.vlgmr.msra.gmra.mrb[58].mxu1 %vm4821_vm5, %v4804_v31 }
 0xe36   :  { %v5648_v63 = vpop.f32.mrb[64].mxu0 }
 0xe37   :  { %v4790_v3 = vadd.f32 %v5648_v63, %v5153_v8  ;;  %v4784_v32 = vpop.f32.mrb[65].mxu0 }
 0xe38   :  { %v4785_v5 = vadd.f32 %v5153_v8, %v4784_v32 }
 0xe39   :  { %v4806_v33 = vmax.f32 %v4790_v3, 0.0 }
 0xe3a   :  { %v4805_v22 = vmax.f32 %v4785_v5, 0.0  ;;  %v5651_v59 = vpop.f32.mrb[66].mxu0 }
 0xe3b   :  { %v4800_v34 = vadd.f32 %v5651_v59, %v5153_v8  ;;  %v4794_v36 = vpop.f32.mrb[67].mxu0 }
 0xe3c   :  { %v4795_v13 = vadd.f32 %v5153_v8, %v4794_v36  ;;  %5671 = vmatprep.mubr.msk.f32.mxu1 %vm4821_vm5, %v4805_v22 }
 0xe3d   :  { %5672 = vmatmul.mubr.msk.f32.gmra.mrb[60].mxu1 %vm4821_vm5, %v4806_v33  ;;  %v4808_v38 = vmax.f32 %v4800_v34, 0.0 }
 0xe3e   :  { %v4807_v16 = vmax.f32 %v4795_v13, 0.0 }
 0xe40   :  { %5674 = vmatprep.mubr.msk.f32.mxu1 %vm4821_vm5, %v4807_v16 }
 0xe41   :  { %5675 = vmatmul.mubr.msk.f32.gmra.mrb[62].mxu1 %vm4821_vm5, %v4808_v38 }
 0xf08   :  { %v5670_v17 = vpop.f32.mrb[58].mxu1 }
 0xf09   :  { %v4912_v42 = vadd.f32 %v5670_v17, %v4820_v19  ;;  %v4906_v45 = vpop.f32.mrb[59].mxu1 }
 0xf0a   :  { %v4907_v46 = vadd.f32 %v4906_v45, %v4820_v19 }
 0xf0b   :  { %v4936_v10 = vadd.f32 %v4912_v42, %v4675_v21  ;;  %v5021_v42 = vsub.s32 7, %v6044_v39  ;;  %v5166_v39 = vld [vmem:[%s6824_s7 + $0x8] ss:$0 sm:$0xff] }
 0xf0c   :  { %v4935_v47 = vadd.f32 %v4907_v46, %v4674_v18 }
 0xf0d   :  { %v4944_v24 = vsel %vm49_vm0, %v4936_v10, 0.0 }
 0xf0e   :  { %4945 = vadd.xlane.f32.xlu1 %v4944_v24  ;;  %v4941_v41 = vsel %vm49_vm0, %v4935_v47, 0.0 }
 0xf0f   :  { %4942 = vadd.xlane.f32.xlu0 %v4941_v41 }
 0xf10   :  { %v5673_v44 = vpop.f32.mrb[60].mxu1 }
 0xf11   :  { %v4922_v12 = vadd.f32 %v5673_v44, %v4820_v19  ;;  %v4916_v49 = vpop.f32.mrb[61].mxu1  ;;  %v5022_v44 = vrot.slane %v6655_v25, %v5021_v42 }
 0xf12   :  { %v4917_v29 = vadd.f32 %v4916_v49, %v4820_v19 }
 0xf13   :  { %v4938_v52 = vadd.f32 %v4922_v12, %v4677_v56 }
 0xf14   :  { %v4937_v51 = vadd.f32 %v4917_v29, %v4676_v50  ;;  %v5676_v57 = vpop.f32.mrb[62].mxu1 }
 0xf15   :  { %v4932_v61 = vadd.f32 %v5676_v57, %v4820_v19  ;;  %v4926_v60 = vpop.f32.mrb[63].mxu1  ;;  %v4950_v7 = vsel %vm49_vm0, %v4938_v52, 0.0 }
 0xf16   :  { %v4927_v1 = vadd.f32 %v4926_v60, %v4820_v19  ;;  %4951 = vadd.xlane.f32.xlu1 %v4950_v7  ;;  %v4947_v6 = vsel %vm49_vm0, %v4937_v51, 0.0 }
 0xf17   :  { %v4940_v9 = vadd.f32 %v4932_v61, %v4679_v0  ;;  %4948 = vadd.xlane.f32.xlu0 %v4947_v6 }
 0xf18   :  { %v4939_v18 = vadd.f32 %v4927_v1, %v6756_v14 }
 0xf19   :  { %v4956_v21 = vsel %vm49_vm0, %v4940_v9, 0.0 }
 0xf1a   :  { %4957 = vadd.xlane.f32.xlu1 %v4956_v21  ;;  %v4953_v23 = vsel %vm49_vm0, %v4939_v18, 0.0 }
 0xf1b   :  { %4954 = vadd.xlane.f32.xlu0 %v4953_v23 }
 0xf9b   :  { %v4946_v40 = vpop.xlane.xlu1 %4945 }
 0xf9c   :  { %v4960_v37 = vmul.f32 0.03125, %v4946_v40  ;;  %v4943_v2 = vpop.xlane.xlu0 %4942 }
 0xf9d   :  { %v4959_v62 = vmul.f32 0.03125, %v4943_v2 }
 0xf9e   :  { %v4966_v54 = vsub.f32 %v4936_v10, %v4960_v37 }
 0xf9f   :  { %v4965_v55 = vsub.f32 %v4935_v47, %v4959_v62 }
 0xfa0   :  { %v4972_v48 = vmul.f32 %v4966_v54, %v4966_v54 }
 0xfa1   :  { %v4971_v50 = vmul.f32 %v4965_v55, %v4965_v55 }
 0xfa2   :  { %v4980_v53 = vsel %vm49_vm0, %v4972_v48, 0.0 }
 0xfa3   :  { %v4952_v56 = vpop.xlane.xlu1 %4951  ;;  %4981 = vadd.xlane.f32.xlu1 %v4980_v53  ;;  %v4977_v11 = vsel %vm49_vm0, %v4971_v50, 0.0 }
 0xfa4   :  { %v4962_v58 = vmul.f32 0.03125, %v4952_v56  ;;  %4978 = vadd.xlane.f32.xlu0 %v4977_v11  ;;  %v4949_v14 = vpop.xlane.xlu0 %4948 }
 0xfa5   :  { %v4961_v0 = vmul.f32 0.03125, %v4949_v14 }
 0xfa6   :  { %v4968_v35 = vsub.f32 %v4938_v52, %v4962_v58 }
 0xfa7   :  { %v4967_v43 = vsub.f32 %v4937_v51, %v4961_v0  ;;  %v4958_v4 = vpop.xlane.xlu1 %4957 }
 0xfa8   :  { %v4964_v8 = vmul.f32 0.03125, %v4958_v4  ;;  %v4955_v26 = vpop.xlane.xlu0 %4954  ;;  %v4974_v27 = vmul.f32 %v4968_v35, %v4968_v35 }
 0xfa9   :  { %v4963_v28 = vmul.f32 0.03125, %v4955_v26  ;;  %v4973_v30 = vmul.f32 %v4967_v43, %v4967_v43 }
 0xfaa   :  { %v4970_v20 = vsub.f32 %v4940_v9, %v4964_v8  ;;  %v4986_v31 = vsel %vm49_vm0, %v4974_v27, 0.0 }
 0xfab   :  { %v4969_v63 = vsub.f32 %v4939_v18, %v4963_v28  ;;  %4987 = vadd.xlane.f32.xlu1 %v4986_v31  ;;  %v4983_v3 = vsel %vm49_vm0, %v4973_v30, 0.0 }
 0xfac   :  { %4984 = vadd.xlane.f32.xlu0 %v4983_v3  ;;  %v4976_v32 = vmul.f32 %v4970_v20, %v4970_v20 }
 0xfad   :  { %v4975_v5 = vmul.f32 %v4969_v63, %v4969_v63 }
 0xfae   :  { %v4992_v22 = vsel %vm49_vm0, %v4976_v32, 0.0 }
 0xfaf   :  { %4993 = vadd.xlane.f32.xlu1 %v4992_v22  ;;  %v4989_v59 = vsel %vm49_vm0, %v4975_v5, 0.0 }
 0xfb0   :  { %4990 = vadd.xlane.f32.xlu0 %v4989_v59 }
0x1030   :  { %v4982_v33 = vpop.xlane.xlu1 %4981 }
0x1031   :  { %v4996_v34 = vmul.f32 0.03125, %v4982_v33  ;;  %v4979_v36 = vpop.xlane.xlu0 %4978 }
0x1032   :  { %v4995_v13 = vmul.f32 0.03125, %v4979_v36 }
0x1033   :  { %v5002_v16 = vadd.f32 1e-05, %v4996_v34 }
0x1034   :  { %v5001_v38 = vadd.f32 1e-05, %v4995_v13 }
0x1035   :  { %5853 = vrsqrt.f32 %v5002_v16 }
0x1036   :  { %5855 = vrsqrt.f32 %v5001_v38 }
0x1038   :  { %v4988_v15 = vpop.xlane.xlu1 %4987 }
0x1039   :  { %v4998_v19 = vmul.f32 0.03125, %v4988_v15  ;;  %v4985_v17 = vpop.xlane.xlu0 %4984 }
0x103a   :  { %v4997_v45 = vmul.f32 0.03125, %v4985_v17 }
0x103b   :  { %v5004_v46 = vadd.f32 1e-05, %v4998_v19 }
0x103c   :  { %v5003_v10 = vadd.f32 1e-05, %v4997_v45  ;;  %v4994_v47 = vpop.xlane.xlu1 %4993 }
0x103d   :  { %5857 = vrsqrt.f32 %v5004_v46  ;;  %v5000_v24 = vmul.f32 0.03125, %v4994_v47  ;;  %v4991_v41 = vpop.xlane.xlu0 %4990 }
0x103e   :  { %5859 = vrsqrt.f32 %v5003_v10  ;;  %v4999_v12 = vmul.f32 0.03125, %v4991_v41 }
0x103f   :  { %v5854_v49 = vpop.eup %5853  ;;  %v5006_v29 = vadd.f32 1e-05, %v5000_v24 }
0x1040   :  { %v5856_v52 = vpop.eup %5855  ;;  %v5014_v51 = vmul.f32 %v5854_v49, %v4966_v54  ;;  %v5005_v57 = vadd.f32 1e-05, %v4999_v12 }
0x1041   :  { %v5013_v61 = vmul.f32 %v5856_v52, %v4965_v55  ;;  %5861 = vrsqrt.f32 %v5006_v29 }
0x1042   :  { %v5024_v60 = vmul.f32 %v5022_v44, %v5014_v51  ;;  %5863 = vrsqrt.f32 %v5005_v57 }
0x1043   :  { %v5023_v7 = vmul.f32 %v5022_v44, %v5013_v61 }
0x1044   :  { %v5034_v1 = vadd.f32 %v5166_v39, %v5024_v60 }
0x1045   :  { %v5033_v6 = vadd.f32 %v5166_v39, %v5023_v7 }
0x1046   :  { %5040 = vst.msk [vmem:[%s6829_s9 + $0x8] sm:$0xff] %vm49_vm0, %v5034_v1 }
0x1047   :  { %v5858_v25 = vpop.eup %5857  ;;  %5039 = vst.msk [vmem:[%s6829_s9] sm:$0xff] %vm49_vm0, %v5033_v6 }
0x1048   :  { %v5860_v9 = vpop.eup %5859  ;;  %v5016_v18 = vmul.f32 %v5858_v25, %v4968_v35 }
0x1049   :  { %v5015_v21 = vmul.f32 %v5860_v9, %v4967_v43 }
0x104a   :  { %v5026_v23 = vmul.f32 %v5022_v44, %v5016_v18 }
0x104b   :  { %v5862_v40 = vpop.eup %5861  ;;  %v5025_v37 = vmul.f32 %v5022_v44, %v5015_v21 }
0x104c   :  { %v5864_v2 = vpop.eup %5863  ;;  %v5036_v62 = vadd.f32 %v5166_v39, %v5026_v23  ;;  %v5018_v54 = vmul.f32 %v5862_v40, %v4970_v20 }
0x104d   :  { %v5035_v55 = vadd.f32 %v5166_v39, %v5025_v37  ;;  %v5017_v48 = vmul.f32 %v5864_v2, %v4969_v63 }
0x104e   :  { %5042 = vst.msk [vmem:[%s6829_s9 + $0x18] sm:$0xff] %vm49_vm0, %v5036_v62  ;;  %v5028_v50 = vmul.f32 %v5022_v44, %v5018_v54 }
0x104f   :  { %5041 = vst.msk [vmem:[%s6829_s9 + $0x10] sm:$0xff] %vm49_vm0, %v5035_v55  ;;  %v5027_v53 = vmul.f32 %v5022_v44, %v5017_v48 }
0x1050   :  { %v5038_v56 = vadd.f32 %v5166_v39, %v5028_v50 }
0x1051   :  { %v5037_v11 = vadd.f32 %v5166_v39, %v5027_v53 }
0x1052   :  { %5044 = vst.msk [vmem:[%s6829_s9 + $0x28] sm:$0xff] %vm49_vm0, %v5038_v56 }
0x1053   :  { %5043 = vst.msk [vmem:[%s6829_s9 + $0x20] sm:$0xff] %vm49_vm0, %v5037_v11 }

</bundles_post_ra>
